<compile_context>
chip_gen: v6e
topology: v6e:2x2x1
jax: 0.10.0
libtpu: 0.0.40
codegen_flags: <defaults>
</compile_context>

<pallas_src>
import math
import functools

import jax
import jax.numpy as jnp
from jax.experimental import pallas as pl
from jax.experimental.pallas import tpu as pltpu


LAYER_LN_EPS = 1e-5  # Residual's LayerNorm(size) uses the nn.LayerNorm default


# ----------------------------- in-kernel helpers -----------------------------

def _layer_norm(x, g, b, eps):
    # gamma * (x - mean) / (std + eps) + beta, std = sqrt(biased variance).
    mean = jnp.mean(x, axis=-1, keepdims=True)
    var = jnp.mean((x - mean) ** 2, axis=-1, keepdims=True)
    std = jnp.sqrt(var)
    return g * (x - mean) / (std + eps) + b


def _gelu(x):
    # Matches the reference module exactly (note: 3.142, not math.pi).
    return 0.5 * x * (1.0 + jnp.tanh(jnp.sqrt(2.0 / 3.142) * (x + 0.044715 * x ** 3)))


# ----------------------------- fused GPT-2 kernel ------------------------------

def gpt2_fused_kernel(x_ref, mask_ref,
                      ln1_g, ln1_b, wqkv, bqkv, wo3, bo,
                      ln2_g, ln2_b, w1, b1, w2, b2,
                      lnf_g, lnf_b,
                      o_ref,
                      *, num_heads, final_eps):
    l = pl.program_id(1)
    num_layers = pl.num_programs(1)

    S = o_ref.shape[1]
    D = o_ref.shape[2]
    head_dim = D // num_heads

    # Layer 0: initialise the resident activation (token emb + pos emb, added
    # in the wrapper).  The output block is resident across the layer axis.
    @pl.when(l == 0)
    def _():
        o_ref[0] = x_ref[0]

    x = o_ref[0]                                            # (S, D) f32, resident

    # --- Residual 1: x + MHA(LN(x)) with causal mask ---
    h = _layer_norm(x, ln1_g[0], ln1_b[0], LAYER_LN_EPS)
    qkv = jnp.dot(h.astype(jnp.bfloat16), wqkv[0],
                  preferred_element_type=jnp.float32) + bqkv[0]         # (S, 3D)

    def split_heads(t):                                     # (S, D) -> (H, S, hd)
        return jnp.transpose(t.reshape(S, num_heads, head_dim), (1, 0, 2))

    q3 = split_heads(qkv[:, 0:D]).astype(jnp.bfloat16)
    k3 = split_heads(qkv[:, D:2 * D]).astype(jnp.bfloat16)
    v3 = split_heads(qkv[:, 2 * D:3 * D]).astype(jnp.bfloat16)

    # 1/sqrt(head_dim) is already folded into the q columns of wqkv/bqkv.
    # TODO(synk): at large S convert this to a K-tiled online-softmax loop with
    # causal tile skipping so the (H, S, S) slabs never materialize.
    s = jnp.einsum('hqd,hkd->hqk', q3, k3,
                   preferred_element_type=jnp.float32)      # (H, S, S)
    s = s + mask_ref[...][None, :, :]                       # additive causal mask
    s = s - jnp.max(s, axis=-1, keepdims=True)
    p = jnp.exp(s)
    p = p * pl.reciprocal(jnp.sum(p, axis=-1, keepdims=True), approx=True)
    o3 = jnp.einsum('hqk,hkd->hqd', p.astype(jnp.bfloat16), v3,
                    preferred_element_type=jnp.float32)     # (H, S, hd)

    # Output projection with head-reshaped weight: concat(o_h) @ Wo + bo
    # == sum_h o_h @ Wo[h] + bo.  No merge-heads scratch / masked stores.
    proj = jnp.einsum('hqd,hdf->hqf', o3.astype(jnp.bfloat16), wo3[0],
                      preferred_element_type=jnp.float32)   # (H, S, D)
    attn = jnp.sum(proj, axis=0) + bo[0]                    # (S, D)
    x1 = x + attn

    # --- Residual 2: x1 + FFN(LN(x1)) ---
    h2 = _layer_norm(x1, ln2_g[0], ln2_b[0], LAYER_LN_EPS)
    f = _gelu(jnp.dot(h2.astype(jnp.bfloat16), w1[0],
                      preferred_element_type=jnp.float32) + b1[0])
    f = jnp.dot(f.astype(jnp.bfloat16), w2[0],
                preferred_element_type=jnp.float32) + b2[0]
    y = x1 + f

    o_ref[0] = y

    # Final LayerNorm fused into the last layer's grid step.
    @pl.when(l == num_layers - 1)
    def _():
        o_ref[0] = _layer_norm(y, lnf_g[...], lnf_b[...], final_eps)


def run_gpt2_fused(x, stacked, lnf_g, lnf_b, *, num_heads, final_eps):
    B, S, D = x.shape
    L = stacked["wqkv"].shape[0]
    d_ff = stacked["w1"].shape[2]
    head_dim = D // num_heads

    # Additive causal mask, computed once in the wrapper; constant block index
    # keeps it resident in VMEM for the whole grid (no per-layer iota rebuild).
    causal_add = jnp.where(jnp.tril(jnp.ones((S, S), dtype=bool)),
                           0.0, -1e30).astype(jnp.float32)

    def layer_spec(*dims):
        return pl.BlockSpec((1,) + tuple(dims),
                            lambda b, l, _n=len(dims): (l,) + (0,) * _n)

    # Explicit scoped-VMEM budget derived from the double-buffered block sizes
    # (generous margin for in-kernel intermediates; clamped to v7x physical).
    act_bytes = S * D * 4
    weight_bytes = (D * 3 * D + D * D + D * d_ff + d_ff * D) * 2          # bf16
    bias_ln_bytes = (3 * D + D + d_ff + D + 4 * D) * 4                    # f32
    misc_bytes = S * S * 4 + 2 * D * 4                                    # mask + ln_f
    per_step = 2 * (act_bytes + weight_bytes + bias_ln_bytes + misc_bytes) + 2 * act_bytes
    vmem_limit = int(min(64 * 1024 * 1024, max(16 * 1024 * 1024, 8 * per_step)))

    kernel = functools.partial(gpt2_fused_kernel,
                               num_heads=num_heads, final_eps=final_eps)

    # TODO(synk): for real dims add a d_ff grid axis (or pl.Buffered(1) on the
    # FFN weight specs) and a TB>1 batch block to amortize weight streaming.
    return pl.pallas_call(
        kernel,
        out_shape=jax.ShapeDtypeStruct((B, S, D), jnp.float32),
        grid=(B, L),
        in_specs=[
            pl.BlockSpec((1, S, D), lambda b, l: (b, 0, 0)),       # activations (aliased)
            pl.BlockSpec((S, S), lambda b, l: (0, 0)),             # additive causal mask
            layer_spec(1, D), layer_spec(1, D),                    # ln1 gamma/beta
            layer_spec(D, 3 * D), layer_spec(1, 3 * D),            # fused qkv W/b (bf16 W)
            layer_spec(num_heads, head_dim, D), layer_spec(1, D),  # out proj W (H,hd,D)/b
            layer_spec(1, D), layer_spec(1, D),                    # ln2 gamma/beta
            layer_spec(D, d_ff), layer_spec(1, d_ff),              # ff lin1 W/b
            layer_spec(d_ff, D), layer_spec(1, D),                 # ff lin2 W/b
            pl.BlockSpec((1, D), lambda b, l: (0, 0)),             # ln_f gamma
            pl.BlockSpec((1, D), lambda b, l: (0, 0)),             # ln_f beta
        ],
        out_specs=pl.BlockSpec((1, S, D), lambda b, l: (b, 0, 0)),  # resident over l
        input_output_aliases={0: 0},                                # reuse the x HBM buffer
        compiler_params=pltpu.CompilerParams(
            dimension_semantics=("parallel", "arbitrary"),
            vmem_limit_bytes=vmem_limit),
    )(x, causal_add,
      stacked["ln1_g"], stacked["ln1_b"],
      stacked["wqkv"], stacked["bqkv"],
      stacked["wo3"], stacked["bo"],
      stacked["ln2_g"], stacked["ln2_b"],
      stacked["w1"], stacked["b1"],
      stacked["w2"], stacked["b2"],
      lnf_g, lnf_b)


# ----------------------------- parameter setup & model ------------------------

def init_params(key, vocab_size, max_seq_len, d_model, d_ff, num_layers, num_heads):
    keys = iter(jax.random.split(key, 2 + num_layers * 6))

    def lin(k, fan_in, fan_out):
        kw, kb = jax.random.split(k)
        w = jax.random.normal(kw, (fan_in, fan_out), jnp.float32) * 0.02
        b = jax.random.normal(kb, (1, fan_out), jnp.float32) * 0.02
        return w, b

    token_emb = jax.random.normal(next(keys), (vocab_size, d_model), jnp.float32) * 0.02
    pos_emb = jax.random.normal(next(keys), (max_seq_len, d_model), jnp.float32) * 0.02

    head_dim = d_model // num_heads
    scale = 1.0 / math.sqrt(head_dim)

    names = ("ln1_g", "ln1_b", "wqkv", "bqkv", "wo3", "bo",
             "ln2_g", "ln2_b", "w1", "b1", "w2", "b2")
    per = {n: [] for n in names}
    for _ in range(num_layers):
        wq, bq = lin(next(keys), d_model, d_model)
        wk, bk = lin(next(keys), d_model, d_model)
        wv, bv = lin(next(keys), d_model, d_model)
        wo, bo = lin(next(keys), d_model, d_model)
        w1, b1 = lin(next(keys), d_model, d_ff)
        w2, b2 = lin(next(keys), d_ff, d_model)
        # Fuse qkv and fold the 1/sqrt(head_dim) attention scale into q.
        per["wqkv"].append(jnp.concatenate([wq * scale, wk, wv], axis=1))
        per["bqkv"].append(jnp.concatenate([bq * scale, bk, bv], axis=1))
        # Output projection reshaped head-major: (D, D) -> (H, head_dim, D).
        per["wo3"].append(wo.reshape(num_heads, head_dim, d_model))
        per["bo"].append(bo)
        per["w1"].append(w1); per["b1"].append(b1)
        per["w2"].append(w2); per["b2"].append(b2)
        per["ln1_g"].append(jnp.ones((1, d_model), jnp.float32))
        per["ln1_b"].append(jnp.zeros((1, d_model), jnp.float32))
        per["ln2_g"].append(jnp.ones((1, d_model), jnp.float32))
        per["ln2_b"].append(jnp.zeros((1, d_model), jnp.float32))

    stacked = {n: jnp.stack(v, axis=0) for n, v in per.items()}
    # Store matmul weights in bf16 (MXU-native; halves weight DMA/VMEM bytes).
    for n in ("wqkv", "wo3", "w1", "w2"):
        stacked[n] = stacked[n].astype(jnp.bfloat16)

    return {
        "token_emb": token_emb,
        "pos_emb": pos_emb,
        "lnf_g": jnp.ones((1, d_model), jnp.float32),
        "lnf_b": jnp.zeros((1, d_model), jnp.float32),
        "stacked": stacked,
    }


def gpt2_forward(input_ids, params, *, num_heads, eps):
    B, S = input_ids.shape
    # TODO(synk): token-embedding gather stays in plain JAX (data-dependent row
    # gather has no clean rectangular BlockSpec at this vocab/seq size).
    x = jnp.take(params["token_emb"], input_ids, axis=0)          # (B, S, D)
    x = x + params["pos_emb"][:S][None]                           # PosEmb add (fused by XLA)
    return run_gpt2_fused(x, params["stacked"],
                          params["lnf_g"], params["lnf_b"],
                          num_heads=num_heads, final_eps=eps)


# ----------------------------- main -------------------------------------------

if __name__ == "__main__":
    vocab_size = 50
    max_seq_len = 64
    d_model = 32
    num_heads = 4
    d_ff = 64
    num_layers = 2
    eps = 1e-5
    B, S = 2, 8

    key = jax.random.PRNGKey(0)
    k_params, k_ids = jax.random.split(key)
    params = init_params(k_params, vocab_size, max_seq_len, d_model, d_ff,
                         num_layers, num_heads)
    input_ids = jax.random.randint(k_ids, (B, S), 0, vocab_size, dtype=jnp.int32)

    fwd = jax.jit(functools.partial(gpt2_forward, num_heads=num_heads, eps=eps))
    out = fwd(input_ids, params)
    out = jax.block_until_ready(out)
    assert out.shape == (B, S, d_model) and out.dtype == jnp.float32
    assert bool(jnp.all(jnp.isfinite(out)))
    print("KERNEL_OK")
</pallas_src>

<mosaic_0001>
module attributes {stable_mosaic.version = 11 : i64} {
  func.func @gpt2_fused_kernel(%arg0: i32, %arg1: i32, %arg2: memref<1x8x32xf32, #tpu.memory_space<vmem>>, %arg3: memref<8x8xf32, #tpu.memory_space<vmem>>, %arg4: memref<1x1x32xf32, #tpu.memory_space<vmem>>, %arg5: memref<1x1x32xf32, #tpu.memory_space<vmem>>, %arg6: memref<1x32x96xbf16, #tpu.memory_space<vmem>>, %arg7: memref<1x1x96xf32, #tpu.memory_space<vmem>>, %arg8: memref<1x4x8x32xbf16, #tpu.memory_space<vmem>>, %arg9: memref<1x1x32xf32, #tpu.memory_space<vmem>>, %arg10: memref<1x1x32xf32, #tpu.memory_space<vmem>>, %arg11: memref<1x1x32xf32, #tpu.memory_space<vmem>>, %arg12: memref<1x32x64xbf16, #tpu.memory_space<vmem>>, %arg13: memref<1x1x64xf32, #tpu.memory_space<vmem>>, %arg14: memref<1x64x32xbf16, #tpu.memory_space<vmem>>, %arg15: memref<1x1x32xf32, #tpu.memory_space<vmem>>, %arg16: memref<1x32xf32, #tpu.memory_space<vmem>>, %arg17: memref<1x32xf32, #tpu.memory_space<vmem>>, %arg18: memref<1x8x32xf32, #tpu.memory_space<vmem>>) attributes {dimension_semantics = [#tpu.dimension_semantics<parallel>, #tpu.dimension_semantics<arbitrary>], iteration_bounds = array<i64: 2, 2>, scalar_prefetch = 0 : i64, scratch_operands = 0 : i64, tpu.core_type = #tpu.core_type<tc>, window_params = [{transform_indices = @transform_0, window_bounds = array<i64: 1, 8, 32>}, {pipeline_mode = #tpu.pipeline_mode<synchronous>, transform_indices = @transform_1, window_bounds = array<i64: 8, 8>}, {transform_indices = @transform_2, window_bounds = array<i64: 1, 1, 32>}, {transform_indices = @transform_3, window_bounds = array<i64: 1, 1, 32>}, {transform_indices = @transform_4, window_bounds = array<i64: 1, 32, 96>}, {transform_indices = @transform_5, window_bounds = array<i64: 1, 1, 96>}, {transform_indices = @transform_6, window_bounds = array<i64: 1, 4, 8, 32>}, {transform_indices = @transform_7, window_bounds = array<i64: 1, 1, 32>}, {transform_indices = @transform_8, window_bounds = array<i64: 1, 1, 32>}, {transform_indices = @transform_9, window_bounds = array<i64: 1, 1, 32>}, {transform_indices = @transform_10, window_bounds = array<i64: 1, 32, 64>}, {transform_indices = @transform_11, window_bounds = array<i64: 1, 1, 64>}, {transform_indices = @transform_12, window_bounds = array<i64: 1, 64, 32>}, {transform_indices = @transform_13, window_bounds = array<i64: 1, 1, 32>}, {pipeline_mode = #tpu.pipeline_mode<synchronous>, transform_indices = @transform_14, window_bounds = array<i64: 1, 32>}, {pipeline_mode = #tpu.pipeline_mode<synchronous>, transform_indices = @transform_15, window_bounds = array<i64: 1, 32>}, {transform_indices = @transform_16, window_bounds = array<i64: 1, 8, 32>}]} {
    %c0_i32 = arith.constant 0 : i32
    %0 = arith.cmpi eq, %arg1, %c0_i32 : i32
    %1 = arith.extui %0 : i1 to i32
    %c0_i32_0 = arith.constant 0 : i32
    %2 = arith.cmpi ne, %1, %c0_i32_0 : i32
    scf.if %2 {
      %c0_68 = arith.constant 0 : index
      %c0_69 = arith.constant 0 : index
      %c0_70 = arith.constant 0 : index
      %141 = vector.load %arg2[%c0_68, %c0_69, %c0_70] : memref<1x8x32xf32, #tpu.memory_space<vmem>>, vector<1x8x32xf32>
      %142 = vector.shape_cast %141 : vector<1x8x32xf32> to vector<8x32xf32>
      %c0_71 = arith.constant 0 : index
      %c0_72 = arith.constant 0 : index
      %c0_73 = arith.constant 0 : index
      %143 = vector.load %arg18[%c0_71, %c0_72, %c0_73] : memref<1x8x32xf32, #tpu.memory_space<vmem>>, vector<1x8x32xf32>
      %144 = vector.shape_cast %143 : vector<1x8x32xf32> to vector<8x32xf32>
      %145 = vector.shape_cast %142 : vector<8x32xf32> to vector<1x8x32xf32>
      tpu.vector_store %arg18[%c0_71, %c0_72, %c0_73], %145 {strides = array<i32>} : memref<1x8x32xf32, #tpu.memory_space<vmem>>, vector<1x8x32xf32>,
    } else {
    }
    %c0 = arith.constant 0 : index
    %c0_1 = arith.constant 0 : index
    %c0_2 = arith.constant 0 : index
    %3 = vector.load %arg18[%c0, %c0_1, %c0_2] : memref<1x8x32xf32, #tpu.memory_space<vmem>>, vector<1x8x32xf32>
    %4 = vector.shape_cast %3 : vector<1x8x32xf32> to vector<8x32xf32>
    %c0_3 = arith.constant 0 : index
    %c0_4 = arith.constant 0 : index
    %c0_5 = arith.constant 0 : index
    %5 = vector.load %arg4[%c0_3, %c0_4, %c0_5] : memref<1x1x32xf32, #tpu.memory_space<vmem>>, vector<1x1x32xf32>
    %6 = vector.shape_cast %5 : vector<1x1x32xf32> to vector<1x32xf32>
    %c0_6 = arith.constant 0 : index
    %c0_7 = arith.constant 0 : index
    %c0_8 = arith.constant 0 : index
    %7 = vector.load %arg5[%c0_6, %c0_7, %c0_8] : memref<1x1x32xf32, #tpu.memory_space<vmem>>, vector<1x1x32xf32>
    %8 = vector.shape_cast %7 : vector<1x1x32xf32> to vector<1x32xf32>
    %cst = arith.constant dense<0.000000e+00> : vector<8xf32>
    %9 = vector.multi_reduction <add>, %4, %cst [1] : vector<8x32xf32> to vector<8xf32>
    %10 = vector.shape_cast %9 : vector<8xf32> to vector<8x1xf32>
    %cst_9 = arith.constant 3.200000e+01 : f32
    %11 = vector.broadcast %cst_9 : f32 to vector<8x1xf32>
    %12 = arith.divf %10, %11 : vector<8x1xf32>
    %13 = vector.broadcast %12 : vector<8x1xf32> to vector<8x32xf32>
    %14 = arith.subf %4, %13 : vector<8x32xf32>
    %15 = arith.mulf %14, %14 : vector<8x32xf32>
    %cst_10 = arith.constant dense<0.000000e+00> : vector<8xf32>
    %16 = vector.multi_reduction <add>, %15, %cst_10 [1] : vector<8x32xf32> to vector<8xf32>
    %17 = vector.shape_cast %16 : vector<8xf32> to vector<8x1xf32>
    %cst_11 = arith.constant 3.200000e+01 : f32
    %18 = vector.broadcast %cst_11 : f32 to vector<8x1xf32>
    %19 = arith.divf %17, %18 : vector<8x1xf32>
    %20 = math.sqrt %19 : vector<8x1xf32>
    %21 = vector.broadcast %12 : vector<8x1xf32> to vector<8x32xf32>
    %22 = arith.subf %4, %21 : vector<8x32xf32>
    %23 = vector.broadcast %6 : vector<1x32xf32> to vector<8x32xf32>
    %24 = arith.mulf %23, %22 : vector<8x32xf32>
    %cst_12 = arith.constant 9.99999974E-6 : f32
    %25 = vector.broadcast %cst_12 : f32 to vector<8x1xf32>
    %26 = arith.addf %20, %25 : vector<8x1xf32>
    %27 = vector.broadcast %26 : vector<8x1xf32> to vector<8x32xf32>
    %28 = arith.divf %24, %27 : vector<8x32xf32>
    %29 = vector.broadcast %8 : vector<1x32xf32> to vector<8x32xf32>
    %30 = arith.addf %28, %29 : vector<8x32xf32>
    %31 = arith.truncf %30 : vector<8x32xf32> to vector<8x32xbf16>
    %c0_13 = arith.constant 0 : index
    %c0_14 = arith.constant 0 : index
    %c0_15 = arith.constant 0 : index
    %32 = vector.load %arg6[%c0_13, %c0_14, %c0_15] : memref<1x32x96xbf16, #tpu.memory_space<vmem>>, vector<1x32x96xbf16>
    %33 = vector.shape_cast %32 : vector<1x32x96xbf16> to vector<32x96xbf16>
    %cst_16 = arith.constant dense<0.000000e+00> : vector<8x96xf32>
    %34 = tpu.matmul %31, %33, %cst_16 {dimension_numbers = #tpu.dot_dimension_numbers<[1], [0], [0], [1], [0, 0, 1, 1], [], []>} : vector<8x32xbf16>, vector<32x96xbf16>, vector<8x96xf32> -> vector<8x96xf32>
    %c0_17 = arith.constant 0 : index
    %c0_18 = arith.constant 0 : index
    %c0_19 = arith.constant 0 : index
    %35 = vector.load %arg7[%c0_17, %c0_18, %c0_19] : memref<1x1x96xf32, #tpu.memory_space<vmem>>, vector<1x1x96xf32>
    %36 = vector.shape_cast %35 : vector<1x1x96xf32> to vector<1x96xf32>
    %37 = vector.broadcast %36 : vector<1x96xf32> to vector<8x96xf32>
    %38 = arith.addf %34, %37 : vector<8x96xf32>
    %39 = vector.extract_strided_slice %38 {offsets = [0, 0], sizes = [8, 32], strides = [1, 1]} : vector<8x96xf32> to vector<8x32xf32>
    %40 = vector.shape_cast %39 : vector<8x32xf32> to vector<8x4x8xf32>
    %41 = tpu.transpose %40, [1, 0, 2] : vector<8x4x8xf32> -> vector<4x8x8xf32>
    %42 = arith.truncf %41 : vector<4x8x8xf32> to vector<4x8x8xbf16>
    %43 = vector.extract_strided_slice %38 {offsets = [0, 32], sizes = [8, 32], strides = [1, 1]} : vector<8x96xf32> to vector<8x32xf32>
    %44 = vector.shape_cast %43 : vector<8x32xf32> to vector<8x4x8xf32>
    %45 = tpu.transpose %44, [1, 0, 2] : vector<8x4x8xf32> -> vector<4x8x8xf32>
    %46 = arith.truncf %45 : vector<4x8x8xf32> to vector<4x8x8xbf16>
    %47 = vector.extract_strided_slice %38 {offsets = [0, 64], sizes = [8, 32], strides = [1, 1]} : vector<8x96xf32> to vector<8x32xf32>
    %48 = vector.shape_cast %47 : vector<8x32xf32> to vector<8x4x8xf32>
    %49 = tpu.transpose %48, [1, 0, 2] : vector<8x4x8xf32> -> vector<4x8x8xf32>
    %50 = arith.truncf %49 : vector<4x8x8xf32> to vector<4x8x8xbf16>
    "tpu.trace_start"() <{level = 10 : i32, message = "hqd,hkd->hqk"}> : () -> ()
    %cst_20 = arith.constant dense<0.000000e+00> : vector<4x8x8xf32>
    %51 = tpu.matmul %42, %46, %cst_20 {dimension_numbers = #tpu.dot_dimension_numbers<[2], [2], [1], [1], [0, 0, 0, 1, 1, 1], [0], [0]>} : vector<4x8x8xbf16>, vector<4x8x8xbf16>, vector<4x8x8xf32> -> vector<4x8x8xf32>
    "tpu.trace_stop"() : () -> ()
    %c0_21 = arith.constant 0 : index
    %c0_22 = arith.constant 0 : index
    %52 = vector.load %arg3[%c0_21, %c0_22] : memref<8x8xf32, #tpu.memory_space<vmem>>, vector<8x8xf32>
    %53 = vector.shape_cast %52 : vector<8x8xf32> to vector<1x8x8xf32>
    %54 = vector.broadcast %53 : vector<1x8x8xf32> to vector<4x8x8xf32>
    %55 = arith.addf %51, %54 : vector<4x8x8xf32>
    %cst_23 = arith.constant dense<0xFF800000> : vector<4x8xf32>
    %56 = vector.multi_reduction <maximumf>, %55, %cst_23 [2] : vector<4x8x8xf32> to vector<4x8xf32>
    %57 = vector.shape_cast %56 : vector<4x8xf32> to vector<4x8x1xf32>
    %58 = vector.broadcast %57 : vector<4x8x1xf32> to vector<4x8x8xf32>
    %59 = arith.subf %55, %58 : vector<4x8x8xf32>
    %60 = math.exp %59 : vector<4x8x8xf32>
    %cst_24 = arith.constant dense<0.000000e+00> : vector<4x8xf32>
    %61 = vector.multi_reduction <add>, %60, %cst_24 [2] : vector<4x8x8xf32> to vector<4x8xf32>
    %62 = vector.shape_cast %61 : vector<4x8xf32> to vector<4x8x1xf32>
    %63 = tpu.reciprocal %62 {approx = true} : vector<4x8x1xf32> -> vector<4x8x1xf32>
    %64 = vector.broadcast %63 : vector<4x8x1xf32> to vector<4x8x8xf32>
    %65 = arith.mulf %60, %64 : vector<4x8x8xf32>
    %66 = arith.truncf %65 : vector<4x8x8xf32> to vector<4x8x8xbf16>
    "tpu.trace_start"() <{level = 10 : i32, message = "hqk,hkd->hqd"}> : () -> ()
    %cst_25 = arith.constant dense<0.000000e+00> : vector<4x8x8xf32>
    %67 = tpu.matmul %66, %50, %cst_25 {dimension_numbers = #tpu.dot_dimension_numbers<[2], [1], [1], [2], [0, 0, 0, 1, 1, 2], [0], [0]>} : vector<4x8x8xbf16>, vector<4x8x8xbf16>, vector<4x8x8xf32> -> vector<4x8x8xf32>
    "tpu.trace_stop"() : () -> ()
    %68 = arith.truncf %67 : vector<4x8x8xf32> to vector<4x8x8xbf16>
    %c0_26 = arith.constant 0 : index
    %c0_27 = arith.constant 0 : index
    %c0_28 = arith.constant 0 : index
    %c0_29 = arith.constant 0 : index
    %69 = vector.load %arg8[%c0_26, %c0_27, %c0_28, %c0_29] : memref<1x4x8x32xbf16, #tpu.memory_space<vmem>>, vector<1x4x8x32xbf16>
    %70 = vector.shape_cast %69 : vector<1x4x8x32xbf16> to vector<4x8x32xbf16>
    "tpu.trace_start"() <{level = 10 : i32, message = "hqd,hdf->hqf"}> : () -> ()
    %cst_30 = arith.constant dense<0.000000e+00> : vector<4x8x32xf32>
    %71 = tpu.matmul %68, %70, %cst_30 {dimension_numbers = #tpu.dot_dimension_numbers<[2], [1], [1], [2], [0, 0, 0, 1, 1, 2], [0], [0]>} : vector<4x8x8xbf16>, vector<4x8x32xbf16>, vector<4x8x32xf32> -> vector<4x8x32xf32>
    "tpu.trace_stop"() : () -> ()
    %cst_31 = arith.constant dense<0.000000e+00> : vector<8x32xf32>
    %72 = vector.multi_reduction <add>, %71, %cst_31 [0] : vector<4x8x32xf32> to vector<8x32xf32>
    %c0_32 = arith.constant 0 : index
    %c0_33 = arith.constant 0 : index
    %c0_34 = arith.constant 0 : index
    %73 = vector.load %arg9[%c0_32, %c0_33, %c0_34] : memref<1x1x32xf32, #tpu.memory_space<vmem>>, vector<1x1x32xf32>
    %74 = vector.shape_cast %73 : vector<1x1x32xf32> to vector<1x32xf32>
    %75 = vector.broadcast %74 : vector<1x32xf32> to vector<8x32xf32>
    %76 = arith.addf %72, %75 : vector<8x32xf32>
    %77 = arith.addf %4, %76 : vector<8x32xf32>
    %c0_35 = arith.constant 0 : index
    %c0_36 = arith.constant 0 : index
    %c0_37 = arith.constant 0 : index
    %78 = vector.load %arg10[%c0_35, %c0_36, %c0_37] : memref<1x1x32xf32, #tpu.memory_space<vmem>>, vector<1x1x32xf32>
    %79 = vector.shape_cast %78 : vector<1x1x32xf32> to vector<1x32xf32>
    %c0_38 = arith.constant 0 : index
    %c0_39 = arith.constant 0 : index
    %c0_40 = arith.constant 0 : index
    %80 = vector.load %arg11[%c0_38, %c0_39, %c0_40] : memref<1x1x32xf32, #tpu.memory_space<vmem>>, vector<1x1x32xf32>
    %81 = vector.shape_cast %80 : vector<1x1x32xf32> to vector<1x32xf32>
    %cst_41 = arith.constant dense<0.000000e+00> : vector<8xf32>
    %82 = vector.multi_reduction <add>, %77, %cst_41 [1] : vector<8x32xf32> to vector<8xf32>
    %83 = vector.shape_cast %82 : vector<8xf32> to vector<8x1xf32>
    %cst_42 = arith.constant 3.200000e+01 : f32
    %84 = vector.broadcast %cst_42 : f32 to vector<8x1xf32>
    %85 = arith.divf %83, %84 : vector<8x1xf32>
    %86 = vector.broadcast %85 : vector<8x1xf32> to vector<8x32xf32>
    %87 = arith.subf %77, %86 : vector<8x32xf32>
    %88 = arith.mulf %87, %87 : vector<8x32xf32>
    %cst_43 = arith.constant dense<0.000000e+00> : vector<8xf32>
    %89 = vector.multi_reduction <add>, %88, %cst_43 [1] : vector<8x32xf32> to vector<8xf32>
    %90 = vector.shape_cast %89 : vector<8xf32> to vector<8x1xf32>
    %cst_44 = arith.constant 3.200000e+01 : f32
    %91 = vector.broadcast %cst_44 : f32 to vector<8x1xf32>
    %92 = arith.divf %90, %91 : vector<8x1xf32>
    %93 = math.sqrt %92 : vector<8x1xf32>
    %94 = vector.broadcast %85 : vector<8x1xf32> to vector<8x32xf32>
    %95 = arith.subf %77, %94 : vector<8x32xf32>
    %96 = vector.broadcast %79 : vector<1x32xf32> to vector<8x32xf32>
    %97 = arith.mulf %96, %95 : vector<8x32xf32>
    %cst_45 = arith.constant 9.99999974E-6 : f32
    %98 = vector.broadcast %cst_45 : f32 to vector<8x1xf32>
    %99 = arith.addf %93, %98 : vector<8x1xf32>
    %100 = vector.broadcast %99 : vector<8x1xf32> to vector<8x32xf32>
    %101 = arith.divf %97, %100 : vector<8x32xf32>
    %102 = vector.broadcast %81 : vector<1x32xf32> to vector<8x32xf32>
    %103 = arith.addf %101, %102 : vector<8x32xf32>
    %104 = arith.truncf %103 : vector<8x32xf32> to vector<8x32xbf16>
    %c0_46 = arith.constant 0 : index
    %c0_47 = arith.constant 0 : index
    %c0_48 = arith.constant 0 : index
    %105 = vector.load %arg12[%c0_46, %c0_47, %c0_48] : memref<1x32x64xbf16, #tpu.memory_space<vmem>>, vector<1x32x64xbf16>
    %106 = vector.shape_cast %105 : vector<1x32x64xbf16> to vector<32x64xbf16>
    %cst_49 = arith.constant dense<0.000000e+00> : vector<8x64xf32>
    %107 = tpu.matmul %104, %106, %cst_49 {dimension_numbers = #tpu.dot_dimension_numbers<[1], [0], [0], [1], [0, 0, 1, 1], [], []>} : vector<8x32xbf16>, vector<32x64xbf16>, vector<8x64xf32> -> vector<8x64xf32>
    %c0_50 = arith.constant 0 : index
    %c0_51 = arith.constant 0 : index
    %c0_52 = arith.constant 0 : index
    %108 = vector.load %arg13[%c0_50, %c0_51, %c0_52] : memref<1x1x64xf32, #tpu.memory_space<vmem>>, vector<1x1x64xf32>
    %109 = vector.shape_cast %108 : vector<1x1x64xf32> to vector<1x64xf32>
    %110 = vector.broadcast %109 : vector<1x64xf32> to vector<8x64xf32>
    %111 = arith.addf %107, %110 : vector<8x64xf32>
    %cst_53 = arith.constant 5.000000e-01 : f32
    %112 = vector.broadcast %cst_53 : f32 to vector<8x64xf32>
    %113 = arith.mulf %112, %111 : vector<8x64xf32>
    %cst_54 = arith.constant 0.636537253 : f32
    %114 = math.sqrt %cst_54 : f32
    %115 = arith.mulf %111, %111 : vector<8x64xf32>
    %116 = arith.mulf %111, %115 : vector<8x64xf32>
    %cst_55 = arith.constant 4.471500e-02 : f32
    %117 = vector.broadcast %cst_55 : f32 to vector<8x64xf32>
    %118 = arith.mulf %117, %116 : vector<8x64xf32>
    %119 = arith.addf %111, %118 : vector<8x64xf32>
    %120 = vector.broadcast %114 : f32 to vector<8x64xf32>
    %121 = arith.mulf %120, %119 : vector<8x64xf32>
    %122 = math.tanh %121 : vector<8x64xf32>
    %cst_56 = arith.constant 1.000000e+00 : f32
    %123 = vector.broadcast %cst_56 : f32 to vector<8x64xf32>
    %124 = arith.addf %123, %122 : vector<8x64xf32>
    %125 = arith.mulf %113, %124 : vector<8x64xf32>
    %126 = arith.truncf %125 : vector<8x64xf32> to vector<8x64xbf16>
    %c0_57 = arith.constant 0 : index
    %c0_58 = arith.constant 0 : index
    %c0_59 = arith.constant 0 : index
    %127 = vector.load %arg14[%c0_57, %c0_58, %c0_59] : memref<1x64x32xbf16, #tpu.memory_space<vmem>>, vector<1x64x32xbf16>
    %128 = vector.shape_cast %127 : vector<1x64x32xbf16> to vector<64x32xbf16>
    %cst_60 = arith.constant dense<0.000000e+00> : vector<8x32xf32>
    %129 = tpu.matmul %126, %128, %cst_60 {dimension_numbers = #tpu.dot_dimension_numbers<[1], [0], [0], [1], [0, 0, 1, 1], [], []>} : vector<8x64xbf16>, vector<64x32xbf16>, vector<8x32xf32> -> vector<8x32xf32>
    %c0_61 = arith.constant 0 : index
    %c0_62 = arith.constant 0 : index
    %c0_63 = arith.constant 0 : index
    %130 = vector.load %arg15[%c0_61, %c0_62, %c0_63] : memref<1x1x32xf32, #tpu.memory_space<vmem>>, vector<1x1x32xf32>
    %131 = vector.shape_cast %130 : vector<1x1x32xf32> to vector<1x32xf32>
    %132 = vector.broadcast %131 : vector<1x32xf32> to vector<8x32xf32>
    %133 = arith.addf %129, %132 : vector<8x32xf32>
    %134 = arith.addf %77, %133 : vector<8x32xf32>
    %c0_64 = arith.constant 0 : index
    %c0_65 = arith.constant 0 : index
    %c0_66 = arith.constant 0 : index
    %135 = vector.load %arg18[%c0_64, %c0_65, %c0_66] : memref<1x8x32xf32, #tpu.memory_space<vmem>>, vector<1x8x32xf32>
    %136 = vector.shape_cast %135 : vector<1x8x32xf32> to vector<8x32xf32>
    %137 = vector.shape_cast %134 : vector<8x32xf32> to vector<1x8x32xf32>
    tpu.vector_store %arg18[%c0_64, %c0_65, %c0_66], %137 {strides = array<i32>} : memref<1x8x32xf32, #tpu.memory_space<vmem>>, vector<1x8x32xf32>,
    %c1_i32 = arith.constant 1 : i32
    %138 = arith.cmpi eq, %arg1, %c1_i32 : i32
    %139 = arith.extui %138 : i1 to i32
    %c0_i32_67 = arith.constant 0 : i32
    %140 = arith.cmpi ne, %139, %c0_i32_67 : i32
    scf.if %140 {
      %c0_68 = arith.constant 0 : index
      %c0_69 = arith.constant 0 : index
      %141 = vector.load %arg16[%c0_68, %c0_69] : memref<1x32xf32, #tpu.memory_space<vmem>>, vector<1x32xf32>
      %c0_70 = arith.constant 0 : index
      %c0_71 = arith.constant 0 : index
      %142 = vector.load %arg17[%c0_70, %c0_71] : memref<1x32xf32, #tpu.memory_space<vmem>>, vector<1x32xf32>
      %cst_72 = arith.constant dense<0.000000e+00> : vector<8xf32>
      %143 = vector.multi_reduction <add>, %134, %cst_72 [1] : vector<8x32xf32> to vector<8xf32>
      %144 = vector.shape_cast %143 : vector<8xf32> to vector<8x1xf32>
      %cst_73 = arith.constant 3.200000e+01 : f32
      %145 = vector.broadcast %cst_73 : f32 to vector<8x1xf32>
      %146 = arith.divf %144, %145 : vector<8x1xf32>
      %147 = vector.broadcast %146 : vector<8x1xf32> to vector<8x32xf32>
      %148 = arith.subf %134, %147 : vector<8x32xf32>
      %149 = arith.mulf %148, %148 : vector<8x32xf32>
      %cst_74 = arith.constant dense<0.000000e+00> : vector<8xf32>
      %150 = vector.multi_reduction <add>, %149, %cst_74 [1] : vector<8x32xf32> to vector<8xf32>
      %151 = vector.shape_cast %150 : vector<8xf32> to vector<8x1xf32>
      %cst_75 = arith.constant 3.200000e+01 : f32
      %152 = vector.broadcast %cst_75 : f32 to vector<8x1xf32>
      %153 = arith.divf %151, %152 : vector<8x1xf32>
      %154 = math.sqrt %153 : vector<8x1xf32>
      %155 = vector.broadcast %146 : vector<8x1xf32> to vector<8x32xf32>
      %156 = arith.subf %134, %155 : vector<8x32xf32>
      %157 = vector.broadcast %141 : vector<1x32xf32> to vector<8x32xf32>
      %158 = arith.mulf %157, %156 : vector<8x32xf32>
      %cst_76 = arith.constant 9.99999974E-6 : f32
      %159 = vector.broadcast %cst_76 : f32 to vector<8x1xf32>
      %160 = arith.addf %154, %159 : vector<8x1xf32>
      %161 = vector.broadcast %160 : vector<8x1xf32> to vector<8x32xf32>
      %162 = arith.divf %158, %161 : vector<8x32xf32>
      %163 = vector.broadcast %142 : vector<1x32xf32> to vector<8x32xf32>
      %164 = arith.addf %162, %163 : vector<8x32xf32>
      %c0_77 = arith.constant 0 : index
      %c0_78 = arith.constant 0 : index
      %c0_79 = arith.constant 0 : index
      %165 = vector.load %arg18[%c0_77, %c0_78, %c0_79] : memref<1x8x32xf32, #tpu.memory_space<vmem>>, vector<1x8x32xf32>
      %166 = vector.shape_cast %165 : vector<1x8x32xf32> to vector<8x32xf32>
      %167 = vector.shape_cast %164 : vector<8x32xf32> to vector<1x8x32xf32>
      tpu.vector_store %arg18[%c0_77, %c0_78, %c0_79], %167 {strides = array<i32>} : memref<1x8x32xf32, #tpu.memory_space<vmem>>, vector<1x8x32xf32>,
    } else {
    }
    return
  }
  func.func @transform_0(%arg0: i32, %arg1: i32) -> (i32, i32, i32) {
    %c0_i32 = arith.constant 0 : i32
    %c0_i32_0 = arith.constant 0 : i32
    %c0_i32_1 = arith.constant 0 : i32
    return %arg0, %c0_i32, %c0_i32_0 : i32, i32, i32
  }
  func.func @transform_1(%arg0: i32, %arg1: i32) -> (i32, i32) {
    %c0_i32 = arith.constant 0 : i32
    %c0_i32_0 = arith.constant 0 : i32
    %c0_i32_1 = arith.constant 0 : i32
    return %c0_i32, %c0_i32_0 : i32, i32
  }
  func.func @transform_2(%arg0: i32, %arg1: i32) -> (i32, i32, i32) {
    %c0_i32 = arith.constant 0 : i32
    %c0_i32_0 = arith.constant 0 : i32
    %c0_i32_1 = arith.constant 0 : i32
    return %arg1, %c0_i32, %c0_i32_0 : i32, i32, i32
  }
  func.func @transform_3(%arg0: i32, %arg1: i32) -> (i32, i32, i32) {
    %c0_i32 = arith.constant 0 : i32
    %c0_i32_0 = arith.constant 0 : i32
    %c0_i32_1 = arith.constant 0 : i32
    return %arg1, %c0_i32, %c0_i32_0 : i32, i32, i32
  }
  func.func @transform_4(%arg0: i32, %arg1: i32) -> (i32, i32, i32) {
    %c0_i32 = arith.constant 0 : i32
    %c0_i32_0 = arith.constant 0 : i32
    %c0_i32_1 = arith.constant 0 : i32
    return %arg1, %c0_i32, %c0_i32_0 : i32, i32, i32
  }
  func.func @transform_5(%arg0: i32, %arg1: i32) -> (i32, i32, i32) {
    %c0_i32 = arith.constant 0 : i32
    %c0_i32_0 = arith.constant 0 : i32
    %c0_i32_1 = arith.constant 0 : i32
    return %arg1, %c0_i32, %c0_i32_0 : i32, i32, i32
  }
  func.func @transform_6(%arg0: i32, %arg1: i32) -> (i32, i32, i32, i32) {
    %c0_i32 = arith.constant 0 : i32
    %c0_i32_0 = arith.constant 0 : i32
    %c0_i32_1 = arith.constant 0 : i32
    %c0_i32_2 = arith.constant 0 : i32
    return %arg1, %c0_i32, %c0_i32_0, %c0_i32_1 : i32, i32, i32, i32
  }
  func.func @transform_7(%arg0: i32, %arg1: i32) -> (i32, i32, i32) {
    %c0_i32 = arith.constant 0 : i32
    %c0_i32_0 = arith.constant 0 : i32
    %c0_i32_1 = arith.constant 0 : i32
    return %arg1, %c0_i32, %c0_i32_0 : i32, i32, i32
  }
  func.func @transform_8(%arg0: i32, %arg1: i32) -> (i32, i32, i32) {
    %c0_i32 = arith.constant 0 : i32
    %c0_i32_0 = arith.constant 0 : i32
    %c0_i32_1 = arith.constant 0 : i32
    return %arg1, %c0_i32, %c0_i32_0 : i32, i32, i32
  }
  func.func @transform_9(%arg0: i32, %arg1: i32) -> (i32, i32, i32) {
    %c0_i32 = arith.constant 0 : i32
    %c0_i32_0 = arith.constant 0 : i32
    %c0_i32_1 = arith.constant 0 : i32
    return %arg1, %c0_i32, %c0_i32_0 : i32, i32, i32
  }
  func.func @transform_10(%arg0: i32, %arg1: i32) -> (i32, i32, i32) {
    %c0_i32 = arith.constant 0 : i32
    %c0_i32_0 = arith.constant 0 : i32
    %c0_i32_1 = arith.constant 0 : i32
    return %arg1, %c0_i32, %c0_i32_0 : i32, i32, i32
  }
  func.func @transform_11(%arg0: i32, %arg1: i32) -> (i32, i32, i32) {
    %c0_i32 = arith.constant 0 : i32
    %c0_i32_0 = arith.constant 0 : i32
    %c0_i32_1 = arith.constant 0 : i32
    return %arg1, %c0_i32, %c0_i32_0 : i32, i32, i32
  }
  func.func @transform_12(%arg0: i32, %arg1: i32) -> (i32, i32, i32) {
    %c0_i32 = arith.constant 0 : i32
    %c0_i32_0 = arith.constant 0 : i32
    %c0_i32_1 = arith.constant 0 : i32
    return %arg1, %c0_i32, %c0_i32_0 : i32, i32, i32
  }
  func.func @transform_13(%arg0: i32, %arg1: i32) -> (i32, i32, i32) {
    %c0_i32 = arith.constant 0 : i32
    %c0_i32_0 = arith.constant 0 : i32
    %c0_i32_1 = arith.constant 0 : i32
    return %arg1, %c0_i32, %c0_i32_0 : i32, i32, i32
  }
  func.func @transform_14(%arg0: i32, %arg1: i32) -> (i32, i32) {
    %c0_i32 = arith.constant 0 : i32
    %c0_i32_0 = arith.constant 0 : i32
    %c0_i32_1 = arith.constant 0 : i32
    return %c0_i32, %c0_i32_0 : i32, i32
  }
  func.func @transform_15(%arg0: i32, %arg1: i32) -> (i32, i32) {
    %c0_i32 = arith.constant 0 : i32
    %c0_i32_0 = arith.constant 0 : i32
    %c0_i32_1 = arith.constant 0 : i32
    return %c0_i32, %c0_i32_0 : i32, i32
  }
  func.func @transform_16(%arg0: i32, %arg1: i32) -> (i32, i32, i32) {
    %c0_i32 = arith.constant 0 : i32
    %c0_i32_0 = arith.constant 0 : i32
    %c0_i32_1 = arith.constant 0 : i32
    return %arg0, %c0_i32, %c0_i32_0 : i32, i32, i32
  }
}

</mosaic_0001>

<bundles_post_ra>
// kernel: gpt2_forward.1
= control target key start
LH: loop header
LB: loop body
LE: loop exit
PB: predicated region body
PF: predicated region fallthrough
CT: control target
= control target key end

     0   :  { %s3419_s0 = inlined_call_operand.hbm [shape: f32[2,8,32], index: 0, kind: input, shape index: {}, may-alias: {0,16}]   ;;  %s3420_s1 = inlined_call_operand.vmem [shape: f32[8,8], index: 1, kind: input, shape index: {}]   ;;  %s3421_s2 = inlined_call_operand.vmem [shape: f32[2,1,32], index: 2, kind: input, shape index: {}]   ;;  %s3422_s3 = inlined_call_operand.vmem [shape: f32[2,1,32], index: 3, kind: input, shape index: {}]   ;;  %s3423_s4 = inlined_call_operand.vmem [shape: bf16[2,32,96], index: 4, kind: input, shape index: {}]   ;;  %s3424_s5 = inlined_call_operand.vmem [shape: f32[2,1,96], index: 5, kind: input, shape index: {}]   ;;  %s3425_s6 = inlined_call_operand.vmem [shape: bf16[2,4,8,32], index: 6, kind: input, shape index: {}]   ;;  %s3426_s7 = inlined_call_operand.vmem [shape: f32[2,1,32], index: 7, kind: input, shape index: {}]   ;;  %s3427_s8 = inlined_call_operand.vmem [shape: f32[2,1,32], index: 8, kind: input, shape index: {}]   ;;  %s3428_s9 = inlined_call_operand.vmem [shape: f32[2,1,32], index: 9, kind: input, shape index: {}]   ;;  %s3429_s10 = inlined_call_operand.vmem [shape: bf16[2,32,64], index: 10, kind: input, shape index: {}]   ;;  %s3430_s11 = inlined_call_operand.vmem [shape: f32[2,1,64], index: 11, kind: input, shape index: {}]   ;;  %s3431_s12 = inlined_call_operand.vmem [shape: bf16[2,64,32], index: 12, kind: input, shape index: {}]   ;;  %s3432_s13 = inlined_call_operand.vmem [shape: f32[2,1,32], index: 13, kind: input, shape index: {}]   ;;  %s3433_s14 = inlined_call_operand.vmem [shape: f32[1,32], index: 14, kind: input, shape index: {}]   ;;  %s3434_s15 = inlined_call_operand.vmem [shape: f32[1,32], index: 15, kind: input, shape index: {}]   ;;  %s3435_s16 = inlined_call_operand.hbm [shape: f32[2,8,32], index: 16, kind: output, shape index: {}, may-alias: {0,16}]  }
   0x1   :  { %3449 = sst [smem:[#allocation21_spill]] %s3419_s0 }
   0x2   :  { %3450 = sst [smem:[#allocation22_spill]] %s3420_s1 }
   0x3   :  { %3451 = sst [smem:[#allocation23_spill]] %s3423_s4 }
   0x4   :  { %3452 = sst [smem:[#allocation24_spill]] %s3425_s6 }
   0x5   :  { %3453 = sst [smem:[#allocation25_spill]] %s3426_s7 }
   0x6   :  { %3454 = sst [smem:[#allocation26_spill]] %s3430_s11 }
   0x7   :  { %3455 = sst [smem:[#allocation27_spill]] %s3431_s12 }
   0x8   :  { %3456 = sst [smem:[#allocation28_spill]] %s3432_s13 }
   0x9   :  { %3457 = sst [smem:[#allocation29_spill]] %s3433_s14 }
   0xa   :  { %3458 = sst [smem:[#allocation30_spill]] %s3434_s15 }
   0xb   :  { %3459 = sst [smem:[#allocation31_spill]] %s3435_s16 }
   0xc   :  { %21 = vsyncpa [#allocation3], 0 }
   0xd   :  { %23 = vsyncpa [#allocation3 + $0x1], 0 }
   0xe   :  { %24 = vsyncpa [#allocation4], 0 }
   0xf   :  { %26 = vsyncpa [#allocation4 + $0x1], 0  ;;  %s2938_s21 = smov 0   ;;  %s2940_s22 = smov 0  }
  0x10   :  { %s2942_s23 = smov 0   ;;  %s2944_s24 = smov 0  }
  0x11   :  { %s2946_s25 = smov 0   ;;  %s2948_s26 = smov 0  }
  0x12   :  { %s2950_s27 = smov 0   ;;  %s2952_s28 = smov 0  }
  0x13 LB: > { %3460 = sst [smem:[#allocation8_spill]] %s2812_s21  ;;  %s2390_s29 = sadd.s32 4294967295, %s2840_s28   ;;  %s2840_s28 = sphi %s2952_s28, %s32_s28   ;;  %s2836_s27 = sphi %s2950_s27, %s3510_s27   ;;  %s2832_s26 = sphi %s2948_s26, %s3509_s26   ;;  %s2828_s25 = sphi %s2946_s25, %s3508_s25   ;;  %s2824_s24 = sphi %s2944_s24, %s3507_s24   ;;  %s2820_s23 = sphi %s2942_s23, %s3506_s23   ;;  %s2816_s22 = sphi %s2940_s22, %s3505_s22   ;;  %s2812_s21 = sphi %s2938_s21, %s3504_s21  }
  0x14   : > { %3461 = sst [smem:[#allocation9_spill]] %s2816_s22  ;;  %s2391_s30 = sadd.s32 4294967294, %s2840_s28  }
  0x15   : > { %3462 = sst [smem:[#allocation10_spill]] %s2820_s23  ;;  %s41_s0 = sadd.s32 1, %s2832_s26 }
  0x16   : > { %3463 = sst [smem:[#allocation11_spill]] %s2828_s25  ;;  %s44_s17 = sadd.s32 1, %s2836_s27 }
  0x17   : > { %3464 = sst [smem:[#allocation12_spill]] %s2832_s26  ;;  %p42_p0 = scmp.ge.s32.totalorder %s41_s0, 2 }
  0x18   : > { %3465 = sst [smem:[#allocation13_spill]] %s2836_s27  ;;  %s51_s18 = sadd.s32 1, %s2820_s23 }
  0x19   : > { %3466 = sst [smem:[#allocation14_spill]] %s2840_s28  ;;  %p58_p1 = scmp.ne.s32.totalorder %s2820_s23, %s2816_s22 }
  0x1a   : > { %p59_p2 = scmp.eq.s32.totalorder %s2840_s28, 0  ;;  %s3512_s0 = smov (%p42_p0, %s41_s0), 0 }
  0x1b   : > { %3467 = sst [smem:[#allocation15_spill]] %s3512_s0  ;;  %s3514_s17 = smov (!%p42_p0, %s44_s17), %s2836_s27 }
  0x1c   : > { %p2989_p3 = por %p59_p2, %p58_p1  ;;  %p64_p4 = scmp.ne.s32.totalorder %s2816_s22, %s2812_s21 }
  0x1d   : > { %p46_p5 = scmp.ge.s32.totalorder %s3514_s17, 2  ;;  %p65_p6 = scmp.eq.s32.totalorder %s2390_s29, 0 }
  0x1e   : > { %p463_p7 = scmp.eq.s32.totalorder %s2390_s29, 3  ;;  %p469_p8 = scmp.eq.s32.totalorder %s2391_s30, 3 }
  0x1f   : > { %s3516_s17 = smov (%p46_p5, %s3514_s17), 0  ;;  %p2997_p9 = por %p65_p6, %p64_p4 }
  0x20   : > { %3469 = sst [smem:[#allocation16_spill]] %s3516_s17  ;;  %p3001_p10 = por %p463_p7, %p58_p1 }
  0x21   : > { %s48_s26 = ssub.s32 %s2836_s27, %s3516_s17  ;;  %p3007_p11 = por %p469_p8, %p64_p4 }
  0x22   : > { %s3471_s0 = scalar_select %p3001_p10, 1, 0 }
  0x23   : > { %s3473_s21 = scalar_select %p3007_p11, 1, 0 }
  0x24   : > { %3472 = sst [smem:[#allocation17_spill]] %s3471_s0  ;;  %p49_p12 = scmp.eq.s32.totalorder %s48_s26, 0 }
  0x25   : > { %3474 = sst [smem:[#allocation18_spill]] %s3473_s21  ;;  %p2603_p13 = scmp.lt.s32.totalorder %s2840_s28, 4 }
  0x26   : > { %s498_s29 = sand.u32 1, %s2820_s23   ;;  %s2395_s25 = sshll.u32 %s2836_s27, 7 }
  0x27   : > { %s3014_s30 = scalar_select %p49_p12, %s2820_s23, %s51_s18  }
  0x28   : > { %s2394_s16 = sshll.u32 %s498_s29, 3  ;;  %s3476_s1 = sld [smem:[#allocation21_spill]] }
  0x29   : > { %3475 = sst [smem:[#allocation19_spill]] %s3014_s30  ;;  %s502_s12 = scalar_lea.vmem [#allocation2], %s2394_s16 }
  0x2a   : > { %s509_s11 = sshll.u32 %s502_s12, 4  ;;  %p3022_p0 = pnand %p2603_p13, %p2989_p3  ;;  %s510_s11 = int_to_ptr.vmem [resolvable:$true] %s509_s11 }
  0x2b   : > { %p2396_p1 = scmp.ge.s32.totalorder %s2840_s28, 1  ;;  %p594_p2 = scmp.lt.s32.totalorder %s2840_s28, 5 }
  0x2c   : > { %s499_s26 = scalar_lea.sflag [#allocation3], %s498_s29  ;;  %p2718_p4 = pneg %p3022_p0 }
  0x2d   : > { %s2729_s18 = scalar_lea.vmem %s510_s11, 128  ;;  %s2842_s14 = smov [#allocation2]  }
  0x2e   : > { %s507_s13 = scalar_lea.hbm %s3476_s1, %s2395_s25  ;;  %p2730_p5 = scmp.ne.s32.totalorder %s510_s11, %s2729_s18 }
  0x2f   : > { %s2734_s1 = sshll.u32 %s2842_s14, 4  ;;  %s2735_s1 = int_to_ptr.vmem [resolvable:$false] %s2734_s1 }
  0x30   : > { %p2732_p6 = pnand %p2730_p5, %p2718_p4  ;;  %s2736_s12 = scalar_lea.vmem %s2735_s1, 256 }
  0x31   : > { %p2737_p8 = scmp.lt.s32.totalorder %s510_s11, %s2735_s1  ;;  %p2738_p12 = scmp.lt.s32.totalorder %s2736_s12, %s2729_s18 }
  0x32   : > { %p2733_p7 = pneg %p2732_p6 }
  0x33   : > { %p2739_p3 = por %p2738_p12, %p2737_p8 }
  0x35   : > { %p2740_p13 = pnand %p2739_p3, %p2733_p7 }
  0x37   : > { %2743 = shalt.err (!%p2740_p13)
}
  0x38   : > { %2598 = dma.hbm_to_vmem [thread:$0]  (!%p3022_p0), %s507_s13, 128, %s510_s11, %s499_s26  }
  0x39   : > { %p595_p11 = pnand %p2396_p1, %p594_p2 }
  0x3b   : > { %598 = sbr.rel (%p595_p11) target bundleno = 2940 (0xb7c), region = 84 }
  0x40   : > { %s3037_s15 = sand.u32 1, %s2816_s22  }
  0x41   : > { %3478 = sst [smem:[#allocation20_spill]] %s3037_s15  ;;  %s2397_s16 = sshll.u32 %s3037_s15, 3 }
  0x42   : > { %s601_s25 = scalar_lea.sflag [#allocation3], %s3037_s15  ;;  %s604_s19 = scalar_lea.vmem [#allocation2], %s2397_s16 }
  0x43   : > { %2803 = dma.done.wait (%p2997_p9), %s601_s25, 128  }
  0x44   : > { %2805 = vsyncadd (%p2997_p9), %s601_s25, 4294967168  ;;  %p697_p0 = scmp.lt.s32.totalorder %s2824_s24, 1  ;;  %s3479_s4 = sld [smem:[#allocation23_spill]] }
  0x45   : > { %s3480_s6 = sld [smem:[#allocation24_spill]]  ;;  %s3103_s12 = scalar_lea.vmem [#allocation5], %s2397_s16 }
  0x46   : > { %s3047_s11 = scalar_select %p697_p0, %s2824_s24, 1 }
  0x47   : > { %s3483_s29 = sld [smem:[#allocation27_spill]]  ;;  %p2407_p9 = scmp.ne.s32.totalorder %s2824_s24, 0 }
  0x48   : > { %s2452_s14 = sshll.u32 %s3047_s11, 4  ;;  %s724_s25 = scalar_lea.vmem %s3428_s9, %s3047_s11 }
  0x49   : > { %s2455_s15 = sshll.u32 %s3047_s11, 5  ;;  %s3484_s28 = sld [smem:[#allocation28_spill]] }
  0x4a   : > { %s3065_s27 = scalar_lea.vmem %s3479_s4, %s2452_s14  ;;  %s3087_s4 = scalar_lea.vmem %s3429_s10, %s2452_s14 }
  0x4b   : > { %s3070_s22 = scalar_lea.vmem %s3480_s6, %s2452_s14  ;;  %s3482_s6 = sld [smem:[#allocation26_spill]] }
  0x4d   : > { %s3097_s7 = scalar_lea.vmem %s3483_s29, %s2455_s15  ;;  %745 = sbr.rel (%p2407_p9) target bundleno = 84 (0x54), region = 92 }
  0x4f   : > { %s740_s1 = scalar_lea.vmem %s3484_s28, %s3047_s11 }
  0x51   : > { %s732_s0 = scalar_lea.vmem %s3482_s6, %s3047_s11 }
  0x52   : > { %v746_v0 = vld [vmem:[%s604_s19] sm:$0xff]  ;;  %vm747_vm0 = vcmask 261120  }
  0x53   : > { %748 = vst.msk [vmem:[%s3103_s12] sm:$0xff] %vm747_vm0, %v746_v0 }
  0x54 PF: > { %vm752_vm1 = vcmask 261120   ;;  %v2678_v8 = vld [vmem:[%s3065_s27 + $0x8] sm:$0xff]   ;;  %v2843_v9 = vmov 0.0   ;;  %vm2844_vm2 = vmmov 0   ;;  %v2679_v10 = vld [vmem:[%s3065_s27] sm:$0xff]   ;;  %s3485_s28 = scalar_lea.vmem %s3421_s2, %s3047_s11  ;;  %s3486_s19 = scalar_lea.vmem %s3422_s3, %s3047_s11  ;;  %v870_v37 = vlaneseq }
  0x55   : > { %2491 = vmatprep.subr.bf16.mxu1 %v2843_v9  ;;  %2495 = vmatprep.mubr.msk.bf16.mxu1 %vm2844_vm2, %v2843_v9  ;;  %v2408_v19 = vld [vmem:[%s3485_s28] ss:$0 sm:$0xff]  ;;  %s3487_s13 = scalar_lea.vmem %s3424_s5, %s3047_s11  ;;  %s2845_s17 = smov 104   ;;  %v2849_v35 = vmov 1983009808   ;;  %vm1310_vm5 = vcmask 64512  }
  0x56   : > { %2492 = vmatpush3.bf16.msra.mxu1 %v2678_v8  ;;  %2505 = vmatprep.subr.bf16.mxu0 %v2843_v9  ;;  %v2409_v22 = vld [vmem:[%s3486_s19] ss:$0 sm:$0xff]  ;;  %s2846_s23 = smov 120   ;;  %s2847_s30 = smov 112   ;;  %v868_v36 = vunpack.c.l.s4 %v2849_v35  ;;  %v871_v39 = vshrl.u32 %v870_v37, 7  ;;  %vm1546_vm6 = vcmask 1043456  }
  0x57   : > { %2493 = vmatprep.subr.bf16.mxu1 %v2843_v9  ;;  %2507 = vmatprep.mubr.msk.bf16.mxu0 %vm2844_vm2, %v2843_v9  ;;  %v2410_v26 = vld [vmem:[%s3487_s13] ss:$0 sm:$0xff]  ;;  %s2848_s21 = smov 96   ;;  %v2850_v41 = vmov 1934713408   ;;  %s3488_s26 = sld [smem:[#allocation22_spill]] }
  0x58   : > { %v869_v38 = vunpack.c.0.s8 %v868_v36  ;;  %v900_v42 = vunpack.c.l.s4 %v2850_v41  ;;  %s2851_s6 = smov 64   ;;  %s3489_s28 = sld [smem:[#allocation25_spill]]  ;;  %vm2088_vm9 = vcmask 523264  }
  0x59   : > { %s3491_s19 = scalar_lea.vmem %s3427_s8, %s3047_s11  ;;  %p2445_p11 = scmp.ne.s32.totalorder %s2824_s24, 1 }
  0x5a   : > { %v3108_v1 = vld [vmem:[%s3103_s12] sm:$0xff]  ;;  %2494 = vmatpush3.bf16.msra.mxu1 %v2679_v10  ;;  %v3161_v45 = vsub.s32 %v869_v38, %v871_v39  ;;  %v901_v49 = vunpack.c.0.s8 %v900_v42  ;;  %s3495_s20 = sld [smem:[#allocation30_spill]] (!%p2445_p11) }
  0x5b   : > { %v753_v2 = vsel %vm752_vm1, %v3108_v1, 0.0  ;;  %2499 = vmatprep.subr.bf16.mxu1 %v2843_v9 }
  0x5c   : > { %754 = vadd.xlane.f32.xlu0 %v753_v2  ;;  %v3171_v55 = vsub.s32 %v901_v49, %v871_v39 }
  0x5e   : > { %s3490_s15 = scalar_lea.vmem %s3489_s28, %s3047_s11 }
  0xe5   : > { %v755_v3 = vpop.xlane.xlu0 %754 }
  0xe6   : > { %v757_v4 = vmul.f32 0.03125, %v755_v3 }
  0xe8   : > { %v758_v5 = vsub.f32 %v3108_v1, %v757_v4 }
  0xea   : > { %v759_v6 = vmul.f32 %v758_v5, %v758_v5  ;;  %v777_v20 = vmul.f32 %v2408_v19, %v758_v5 }
  0xec   : > { %v760_v7 = vsel %vm752_vm1, %v759_v6, 0.0 }
  0xed   : > { %761 = vadd.xlane.f32.xlu0 %v760_v7 }
 0x176   : > { %v762_v11 = vpop.xlane.xlu0 %761 }
 0x177   : > { %v763_v12 = vmul.f32 0.03125, %v762_v11 }
 0x179   : > { %2686 = vrsqrt.f32 %v763_v12  ;;  %vm766_vm3 = vcmp.eq.f32.partialorder %v763_v12, inf  ;;  %v769_v15 = vand.u32 2147483648, %v763_v12  ;;  %vm768_vm4 = vcmp.eq.f32.partialorder %v763_v12, 0.0 }
 0x186   : > { %v2687_v13 = vpop.eup %2686 }
 0x187   : > { %v765_v14 = vmul.f32 %v2687_v13, %v763_v12 }
 0x189   : > { %v767_v16 = vsel %vm766_vm3, %v763_v12, %v765_v14 }
 0x18a   : > { %v770_v17 = vsel %vm768_vm4, %v769_v15, %v767_v16 }
 0x18b   : > { %v778_v18 = vadd.f32 1e-05, %v770_v17 }
 0x18d   : > { %2688 = vrcp.f32 %v778_v18 }
 0x19a   : > { %v2689_v21 = vpop.eup %2688 }
 0x19b   : > { %v780_v23 = vmul.f32 %v2689_v21, %v777_v20 }
 0x19d   : > { %v787_v24 = vadd.f32 %v2409_v22, %v780_v23 }
 0x19f   : > { %v788_v25 = vpack.c.bf16 %v787_v24, %v787_v24 }
 0x1a1   : > { %2496 = vmatmul.mubr.msk.bf16.vlgmr.msra.gmra.mxu1 %vm752_vm1, %v788_v25 }
 0x1a2   : > { %2501 = vmatprep.mubr.msk.bf16.mxu1 %vm2844_vm2, %v2843_v9 }
 0x261   : > { %v849_v27 = vpop.f32.mrf.mxu1 }
 0x262   : > { %v3142_v28 = vadd.f32 %v2410_v26, %v849_v27 }
 0x263   : > { %v2497_v29 = vpop.f32.mrf.mxu1 }
 0x264   : > { %862 = vrot.lane.b32.xlu0 %v3142_v28, %s2845_s17  ;;  %856 = vrot.lane.b32.xlu1 %v3142_v28, %s2846_s23 }
 0x265   : > { %v852_v30 = vpop.f32.mrf.mxu1 }
 0x267   : > { %v2498_v31 = vpop.f32.mrf.mxu1 }
 0x268   : > { %859 = vrot.lane.b32.xlu1 %v3142_v28, %s2847_s30 }
 0x26c   : > { %1005 = vrot.lane.b32.xlu1 %v3142_v28, %s2848_s21 }
 0x2d6   : > { %v3148_v32 = vpop.permute.xlu1 %856  ;;  %v3154_v34 = vpop.permute.xlu0 %862 }
 0x2d7   : > { %1007 = vrot.lane.b32.xlu1 %v3148_v32, %s2848_s21  ;;  %v881_v46 = vcombine.low %v3148_v32, %v3154_v34  ;;  %v882_v47 = vcombine.high %v3148_v32, %v3154_v34 }
 0x2d9   : > { %v889_v52 = vrot.slane %v881_v46, %v3161_v45  ;;  %v896_v53 = vrot.slane %v882_v47, %v3161_v45 }
 0x2da   : > { %v3151_v33 = vpop.permute.xlu1 %859 }
 0x2db   : > { %1009 = vrot.lane.b32.xlu1 %v3151_v33, %s2848_s21  ;;  %v865_v43 = vcombine.low %v3142_v28, %v3151_v33  ;;  %v866_v44 = vcombine.high %v3142_v28, %v3151_v33 }
 0x2dd   : > { %v873_v50 = vrot.slane %v865_v43, %v3161_v45  ;;  %v880_v51 = vrot.slane %v866_v44, %v3161_v45 }
 0x2de   : > { %v1006_v40 = vpop.permute.xlu1 %1005 }
 0x2df   : > { %1011 = vrot.lane.b32.xlu1 %v3154_v34, %s2848_s21  ;;  %v897_v56 = vcombine.low %v873_v50, %v889_v52  ;;  %v898_v57 = vcombine.high %v873_v50, %v889_v52  ;;  %v913_v58 = vcombine.low %v880_v51, %v896_v53  ;;  %v914_v59 = vcombine.high %v880_v51, %v896_v53 }
 0x2e1   : > { %v905_v2 = vrot.slane %v897_v56, %v3171_v55  ;;  %v912_v3 = vrot.slane %v898_v57, %v3171_v55  ;;  %v921_v4 = vrot.slane %v913_v58, %v3171_v55  ;;  %v928_v5 = vrot.slane %v914_v59, %v3171_v55 }
 0x2e3   : > { %v933_v15 = vcombine.low %v905_v2, %v912_v3  ;;  %v2414_v16 = vcombine.high %v905_v2, %v912_v3  ;;  %v949_v17 = vcombine.low %v921_v4, %v928_v5  ;;  %v2415_v18 = vcombine.high %v921_v4, %v928_v5 }
 0x2e5   : > { %v940_v27 = vrot.slane %v933_v15, %v3161_v45  ;;  %v948_v29 = vrot.slane %v2414_v16, %v3161_v45  ;;  %v956_v30 = vrot.slane %v949_v17, %v3161_v45  ;;  %v964_v31 = vrot.slane %v2415_v18, %v3161_v45  ;;  %v1309_v15 = vld [vmem:[%s3488_s26] sm:$0xff] }
 0x2e7   : > { %v965_v46 = vcombine.low %v940_v27, %v948_v29  ;;  %v981_v47 = vcombine.low %v956_v30, %v964_v31 }
 0x2e9   : > { %v989_v56 = vrot.slane %v981_v47, %v3171_v55 }
 0x349   : > { %v1008_v48 = vpop.permute.xlu1 %1007 }
 0x34d   : > { %v1010_v54 = vpop.permute.xlu1 %1009 }
 0x34e   : > { %v1017_v60 = vcombine.low %v1006_v40, %v1010_v54  ;;  %v1018_v61 = vcombine.high %v1006_v40, %v1010_v54  ;;  %v973_v54 = vrot.slane %v965_v46, %v3171_v55 }
 0x350   : > { %v1025_v6 = vrot.slane %v1017_v60, %v3161_v45  ;;  %v1032_v7 = vrot.slane %v1018_v61, %v3161_v45  ;;  %v966_v61 = vcombine.high %v940_v27, %v948_v29 }
 0x351   : > { %v1012_v62 = vpop.permute.xlu1 %1011 }
 0x352   : > { %v1033_v63 = vcombine.low %v1008_v48, %v1012_v62  ;;  %v1034_v0 = vcombine.high %v1008_v48, %v1012_v62  ;;  %v997_v62 = vcombine.low %v973_v54, %v989_v56 }
 0x354   : > { %v1041_v8 = vrot.slane %v1033_v63, %v3161_v45  ;;  %v1048_v10 = vrot.slane %v1034_v0, %v3161_v45  ;;  %v998_v63 = vcombine.high %v973_v54, %v989_v56  ;;  %v982_v0 = vcombine.high %v956_v30, %v964_v31 }
 0x355   : > { %v1001_v4 = vpack.c.bf16 %v997_v62, %v997_v62 }
 0x356   : > { %v1049_v11 = vcombine.low %v1025_v6, %v1041_v8  ;;  %v1050_v12 = vcombine.high %v1025_v6, %v1041_v8  ;;  %v1065_v13 = vcombine.low %v1032_v7, %v1048_v10  ;;  %v1066_v14 = vcombine.high %v1032_v7, %v1048_v10 }
 0x357   : > { %v1002_v5 = vpack.c.bf16 %v998_v63, %v998_v63  ;;  %v980_v6 = vrot.slane %v966_v61, %v3171_v55  ;;  %v996_v7 = vrot.slane %v982_v0, %v3171_v55 }
 0x358   : > { %v1057_v19 = vrot.slane %v1049_v11, %v3171_v55  ;;  %v1064_v20 = vrot.slane %v1050_v12, %v3171_v55  ;;  %v1073_v21 = vrot.slane %v1065_v13, %v3171_v55  ;;  %v1080_v22 = vrot.slane %v1066_v14, %v3171_v55 }
 0x359   : > { %v999_v11 = vcombine.low %v980_v6, %v996_v7  ;;  %v1000_v12 = vcombine.high %v980_v6, %v996_v7 }
 0x35a   : > { %v1085_v23 = vcombine.low %v1057_v19, %v1064_v20  ;;  %v2416_v24 = vcombine.high %v1057_v19, %v1064_v20  ;;  %v1101_v25 = vcombine.low %v1073_v21, %v1080_v22  ;;  %v2417_v26 = vcombine.high %v1073_v21, %v1080_v22 }
 0x35b   : > { %v1003_v13 = vpack.c.bf16 %v999_v11, %v999_v11  ;;  %v1004_v14 = vpack.c.bf16 %v1000_v12, %v1000_v12 }
 0x35c   : > { %v1092_v35 = vrot.slane %v1085_v23, %v3161_v45  ;;  %v1100_v36 = vrot.slane %v2416_v24, %v3161_v45  ;;  %v1108_v37 = vrot.slane %v1101_v25, %v3161_v45  ;;  %v1116_v38 = vrot.slane %v2417_v26, %v3161_v45 }
 0x35e   : > { %v1117_v39 = vcombine.low %v1092_v35, %v1100_v36  ;;  %v1133_v40 = vcombine.low %v1108_v37, %v1116_v38  ;;  %v1118_v41 = vcombine.high %v1092_v35, %v1100_v36  ;;  %v1134_v42 = vcombine.high %v1108_v37, %v1116_v38 }
 0x360   : > { %v1125_v43 = vrot.slane %v1117_v39, %v3171_v55  ;;  %v1141_v44 = vrot.slane %v1133_v40, %v3171_v55  ;;  %v1132_v50 = vrot.slane %v1118_v41, %v3171_v55  ;;  %v1148_v51 = vrot.slane %v1134_v42, %v3171_v55 }
 0x362   : > { %v1149_v48 = vcombine.low %v1125_v43, %v1141_v44  ;;  %v1150_v49 = vcombine.high %v1125_v43, %v1141_v44  ;;  %v1151_v59 = vcombine.low %v1132_v50, %v1148_v51  ;;  %v1152_v60 = vcombine.high %v1132_v50, %v1148_v51 }
 0x364   : > { %v1153_v52 = vpack.c.bf16 %v1149_v48, %v1149_v48  ;;  %v1154_v53 = vpack.c.bf16 %v1150_v49, %v1150_v49  ;;  %v1155_v2 = vpack.c.bf16 %v1151_v59, %v1151_v59  ;;  %v1156_v3 = vpack.c.bf16 %v1152_v60, %v1152_v60 }
 0x366   : > { %v1315_v57 = vsel %vm1310_vm5, %v1153_v52, 0  ;;  %v1361_v58 = vsel %vm1310_vm5, %v1154_v53, 0  ;;  %v1407_v8 = vsel %vm1310_vm5, %v1155_v2, 0  ;;  %v1453_v10 = vsel %vm1310_vm5, %v1156_v3, 0 }
 0x367   : > { %2500 = vmatpush3.bf16.xpose.msra.mxu1 %v1315_v57  ;;  %2506 = vmatpush3.bf16.xpose.msra.mxu0 %v1361_v58 }
 0x368   : > { %2511 = vmatprep.subr.bf16.mxu1 %v2843_v9  ;;  %2517 = vmatprep.subr.bf16.mxu0 %v2843_v9 }
 0x36e   : > { %2502 = vmatmul.mubr.msk.bf16.vlgmr.msra.gmra.mxu1 %vm1310_vm5, %v1001_v4  ;;  %2508 = vmatmul.mubr.msk.bf16.vlgmr.msra.gmra.mxu0 %vm1310_vm5, %v1002_v5 }
 0x36f   : > { %2512 = vmatpush3.bf16.xpose.msra.mxu1 %v1407_v8  ;;  %2518 = vmatpush3.bf16.xpose.msra.mxu0 %v1453_v10 }
 0x370   : > { %2513 = vmatprep.mubr.msk.bf16.mxu1 %vm2844_vm2, %v2843_v9  ;;  %2519 = vmatprep.mubr.msk.bf16.mxu0 %vm2844_vm2, %v2843_v9 }
 0x371   : > { %2523 = vmatprep.subr.bf16.mxu1 %v2843_v9  ;;  %2529 = vmatprep.subr.bf16.mxu0 %v2843_v9 }
 0x376   : > { %2514 = vmatmul.mubr.msk.bf16.vlgmr.msra.gmra.mxu1 %vm1310_vm5, %v1003_v13  ;;  %2520 = vmatmul.mubr.msk.bf16.vlgmr.msra.gmra.mxu0 %vm1310_vm5, %v1004_v14 }
 0x377   : > { %2525 = vmatprep.mubr.msk.bf16.mxu1 %vm2844_vm2, %v2843_v9  ;;  %2531 = vmatprep.mubr.msk.bf16.mxu0 %vm2844_vm2, %v2843_v9 }
 0x42e   : > { %v1351_v16 = vpop.f32.mrf.mxu1  ;;  %v1397_v17 = vpop.f32.mrf.mxu0 }
 0x42f   : > { %v1352_v18 = vadd.f32 %v1351_v16, %v1309_v15  ;;  %v1398_v19 = vadd.f32 %v1397_v17, %v1309_v15 }
 0x430   : > { %v2503_v20 = vpop.f32.mrf.mxu1  ;;  %v2509_v21 = vpop.f32.mrf.mxu0 }
 0x431   : > { %v1498_v22 = vsel %vm1310_vm5, %v1398_v19, -inf  ;;  %v1495_v23 = vsel %vm1310_vm5, %v1352_v18, -inf }
 0x432   : > { %1499 = vmax.xlane.f32.xlu0 %v1498_v22  ;;  %v1400_v24 = vpop.f32.mrf.mxu0  ;;  %1496 = vmax.xlane.f32.xlu1 %v1495_v23  ;;  %v1354_v25 = vpop.f32.mrf.mxu1 }
 0x434   : > { %v2504_v26 = vpop.f32.mrf.mxu1  ;;  %v2510_v27 = vpop.f32.mrf.mxu0 }
 0x436   : > { %v1443_v29 = vpop.f32.mrf.mxu1  ;;  %v1489_v30 = vpop.f32.mrf.mxu0 }
 0x437   : > { %v1444_v31 = vadd.f32 %v1443_v29, %v1309_v15  ;;  %v1490_v35 = vadd.f32 %v1489_v30, %v1309_v15 }
 0x438   : > { %v2515_v36 = vpop.f32.mrf.mxu1  ;;  %v2521_v37 = vpop.f32.mrf.mxu0 }
 0x439   : > { %v1504_v38 = vsel %vm1310_vm5, %v1490_v35, -inf  ;;  %v1501_v39 = vsel %vm1310_vm5, %v1444_v31, -inf }
 0x43a   : > { %1505 = vmax.xlane.f32.xlu0 %v1504_v38  ;;  %v1492_v40 = vpop.f32.mrf.mxu0  ;;  %1502 = vmax.xlane.f32.xlu1 %v1501_v39  ;;  %v1446_v41 = vpop.f32.mrf.mxu1 }
 0x43c   : > { %v2516_v42 = vpop.f32.mrf.mxu1  ;;  %v2522_v43 = vpop.f32.mrf.mxu0 }
 0x44b   : > { %1157 = vrot.lane.b32.xlu1 %v3142_v28, %s2851_s6 }
 0x4bb   : > { %v1500_v44 = vpop.xlane.xlu0 %1499  ;;  %v1497_v46 = vpop.xlane.xlu1 %1496 }
 0x4bc   : > { %v1508_v47 = vsub.f32 %v1398_v19, %v1500_v44  ;;  %v1507_v48 = vsub.f32 %v1352_v18, %v1497_v46 }
 0x4be   : > { %v1513_v49 = vmul.f32 1.442695, %v1508_v47  ;;  %v1511_v50 = vmul.f32 1.442695, %v1507_v48 }
 0x4c0   : > { %2690 = vpow2.f32 %v1513_v49 }
 0x4c1   : > { %2692 = vpow2.f32 %v1511_v50 }
 0x4c3   : > { %v1503_v28 = vpop.xlane.xlu1 %1502  ;;  %v1506_v57 = vpop.xlane.xlu0 %1505 }
 0x4c4   : > { %v1509_v56 = vsub.f32 %v1444_v31, %v1503_v28  ;;  %v1510_v59 = vsub.f32 %v1490_v35, %v1506_v57 }
 0x4c6   : > { %v1515_v58 = vmul.f32 1.442695, %v1509_v56  ;;  %v1517_v60 = vmul.f32 1.442695, %v1510_v59 }
 0x4c8   : > { %2694 = vpow2.f32 %v1515_v58 }
 0x4c9   : > { %2696 = vpow2.f32 %v1517_v60 }
 0x4cd   : > { %v3229_v51 = vpop.eup %2690 }
 0x4ce   : > { %v3231_v52 = vpop.eup %2692  ;;  %v1522_v53 = vsel %vm1310_vm5, %v3229_v51, 0.0 }
 0x4cf   : > { %1523 = vadd.xlane.f32.xlu0 %v1522_v53  ;;  %v1519_v54 = vsel %vm1310_vm5, %v3231_v52, 0.0 }
 0x4d0   : > { %1520 = vadd.xlane.f32.xlu1 %v1519_v54 }
 0x4d5   : > { %v3240_v61 = vpop.eup %2694 }
 0x4d6   : > { %v1525_v62 = vsel %vm1310_vm5, %v3240_v61, 0.0  ;;  %v3244_v63 = vpop.eup %2696 }
 0x4e1   : > { %1161 = vrot.lane.b32.xlu1 %v3151_v33, %s2851_s6  ;;  %v1528_v33 = vsel %vm1310_vm5, %v3244_v63, 0.0 }
 0x4e5   : > { %1163 = vrot.lane.b32.xlu1 %v3154_v34, %s2851_s6  ;;  %1159 = vrot.lane.b32.xlu0 %v3148_v32, %s2851_s6  ;;  %v1158_v32 = vpop.permute.xlu1 %1157 }
 0x504   : > { %1526 = vadd.xlane.f32.xlu0 %v1525_v62 }
 0x509   : > { %1529 = vadd.xlane.f32.xlu1 %v1528_v33 }
 0x558   : > { %v1524_v0 = vpop.xlane.xlu0 %1523 }
 0x559   : > { %v1521_v34 = vpop.xlane.xlu1 %1520  ;;  %2698 = vrcp.f32 %v1524_v0 }
 0x55a   : > { %2700 = vrcp.f32 %v1521_v34 }
 0x55c   : > { %v1160_v5 = vpop.permute.xlu0 %1159 }
 0x55d   : > { %v1162_v2 = vpop.permute.xlu1 %1161 }
 0x55e   : > { %v1169_v3 = vcombine.low %v1158_v32, %v1162_v2  ;;  %v1170_v4 = vcombine.high %v1158_v32, %v1162_v2 }
 0x560   : > { %v1177_v10 = vrot.slane %v1169_v3, %v3161_v45  ;;  %v1184_v11 = vrot.slane %v1170_v4, %v3161_v45  ;;  %v1732_v3 = vld [vmem:[%s3070_s22] sm:$0xf]  ;;  %v1733_v4 = vld [vmem:[%s3070_s22 + $0x4] sm:$0xf] }
 0x561   : > { %v1164_v6 = vpop.permute.xlu1 %1163 }
 0x562   : > { %v1185_v7 = vcombine.low %v1160_v5, %v1164_v6  ;;  %v1186_v8 = vcombine.high %v1160_v5, %v1164_v6  ;;  %v1786_v5 = vsel %vm1546_vm6, %v1733_v4, 0  ;;  %v1735_v6 = vld [vmem:[%s3070_s22 + $0xc] sm:$0xf] }
 0x564   : > { %v1193_v12 = vrot.slane %v1185_v7, %v3161_v45  ;;  %v1200_v13 = vrot.slane %v1186_v8, %v3161_v45 }
 0x566   : > { %v1201_v14 = vcombine.low %v1177_v10, %v1193_v12  ;;  %v1202_v15 = vcombine.high %v1177_v10, %v1193_v12  ;;  %v1217_v16 = vcombine.low %v1184_v11, %v1200_v13  ;;  %v1218_v17 = vcombine.high %v1184_v11, %v1200_v13  ;;  %v2699_v38 = vpop.eup %2698 }
 0x567   : > { %v2701_v39 = vpop.eup %2700  ;;  %v1536_v53 = vmul.f32 %v2699_v38, %v3229_v51  ;;  %v1878_v13 = vsel %vm1546_vm6, %v1735_v6, 0 }
 0x568   : > { %v1209_v18 = vrot.slane %v1201_v14, %v3171_v55  ;;  %v1216_v19 = vrot.slane %v1202_v15, %v3171_v55  ;;  %v1225_v20 = vrot.slane %v1217_v16, %v3171_v55  ;;  %v1232_v21 = vrot.slane %v1218_v17, %v3171_v55 }
 0x569   : > { %v1535_v50 = vmul.f32 %v2701_v39, %v3231_v52  ;;  %v1540_v58 = vpack.c.bf16 %v1536_v53, %v1536_v53 }
 0x56a   : > { %v1237_v22 = vcombine.low %v1209_v18, %v1216_v19  ;;  %v2418_v23 = vcombine.high %v1209_v18, %v1216_v19  ;;  %v1253_v24 = vcombine.low %v1225_v20, %v1232_v21  ;;  %v2419_v25 = vcombine.high %v1225_v20, %v1232_v21 }
 0x56c   : > { %v1244_v26 = vrot.slane %v1237_v22, %v3161_v45  ;;  %v1252_v27 = vrot.slane %v2418_v23, %v3161_v45  ;;  %v1260_v29 = vrot.slane %v1253_v24, %v3161_v45  ;;  %v1268_v30 = vrot.slane %v2419_v25, %v3161_v45 }
 0x56e   : > { %v1269_v31 = vcombine.low %v1244_v26, %v1252_v27  ;;  %v1285_v35 = vcombine.low %v1260_v29, %v1268_v30  ;;  %v1270_v36 = vcombine.high %v1244_v26, %v1252_v27  ;;  %v1286_v37 = vcombine.high %v1260_v29, %v1268_v30 }
 0x570   : > { %v1277_v40 = vrot.slane %v1269_v31, %v3171_v55  ;;  %v1293_v41 = vrot.slane %v1285_v35, %v3171_v55  ;;  %v1284_v42 = vrot.slane %v1270_v36, %v3171_v55  ;;  %v1300_v43 = vrot.slane %v1286_v37, %v3171_v55 }
 0x571   : > { %v1539_v55 = vpack.c.bf16 %v1535_v50, %v1535_v50 }
 0x572   : > { %v1301_v44 = vcombine.low %v1277_v40, %v1293_v41  ;;  %v1302_v46 = vcombine.high %v1277_v40, %v1293_v41  ;;  %v1303_v47 = vcombine.low %v1284_v42, %v1300_v43  ;;  %v1304_v48 = vcombine.high %v1284_v42, %v1300_v43 }
 0x574   : > { %v1305_v45 = vpack.c.bf16 %v1301_v44, %v1301_v44  ;;  %v1306_v49 = vpack.c.bf16 %v1302_v46, %v1302_v46  ;;  %v1307_v56 = vpack.c.bf16 %v1303_v47, %v1303_v47  ;;  %v1308_v57 = vpack.c.bf16 %v1304_v48, %v1304_v48 }
 0x576   : > { %v1548_v54 = vsel %vm1546_vm6, %v1305_v45, 0  ;;  %v1594_v28 = vsel %vm1546_vm6, %v1306_v49, 0  ;;  %v1640_v51 = vsel %vm1546_vm6, %v1307_v56, 0  ;;  %v1686_v52 = vsel %vm1546_vm6, %v1308_v57, 0 }
 0x577   : > { %2524 = vmatpush3.bf16.msra.mxu1 %v1548_v54  ;;  %2530 = vmatpush3.bf16.msra.mxu0 %v1594_v28  ;;  %v2432_v54 = vld [vmem:[%s3490_s15] ss:$0 sm:$0xff] }
 0x578   : > { %2535 = vmatprep.subr.bf16.mxu1 %v2843_v9  ;;  %2541 = vmatprep.subr.bf16.mxu0 %v2843_v9 }
 0x57a   : > { %2526 = vmatmul.mubr.msk.bf16.vlgmr.msra.gmra.mxu1 %vm1310_vm5, %v1539_v55  ;;  %2532 = vmatmul.mubr.msk.bf16.vlgmr.msra.gmra.mxu0 %vm1310_vm5, %v1540_v58 }
 0x57b   : > { %2536 = vmatpush3.bf16.msra.mxu1 %v1640_v51  ;;  %2542 = vmatpush3.bf16.msra.mxu0 %v1686_v52 }
 0x57c   : > { %2537 = vmatprep.mubr.msk.bf16.mxu1 %vm2844_vm2, %v2843_v9  ;;  %2543 = vmatprep.mubr.msk.bf16.mxu0 %vm2844_vm2, %v2843_v9 }
 0x57d   : > { %2547 = vmatprep.subr.bf16.mxu1 %v2843_v9  ;;  %2553 = vmatprep.subr.bf16.mxu0 %v2843_v9 }
 0x58d   : > { %v1527_v59 = vpop.xlane.xlu0 %1526 }
 0x58e   : > { %2702 = vrcp.f32 %v1527_v59 }
 0x592   : > { %v1530_v60 = vpop.xlane.xlu1 %1529 }
 0x593   : > { %2704 = vrcp.f32 %v1530_v60 }
 0x59b   : > { %v2703_v62 = vpop.eup %2702 }
 0x59c   : > { %v1537_v33 = vmul.f32 %v2703_v62, %v3240_v61  ;;  %v1740_v61 = vsel %vm1546_vm6, %v1732_v3, 0 }
 0x59e   : > { %v1541_v32 = vpack.c.bf16 %v1537_v33, %v1537_v33 }
 0x5a0   : > { %v2705_v34 = vpop.eup %2704  ;;  %2538 = vmatmul.mubr.msk.bf16.vlgmr.msra.gmra.mxu1 %vm1310_vm5, %v1541_v32 }
 0x5a1   : > { %v1538_v0 = vmul.f32 %v2705_v34, %v3244_v63  ;;  %2549 = vmatprep.mubr.msk.bf16.mxu1 %vm2844_vm2, %v2843_v9  ;;  %2548 = vmatpush3.bf16.msra.mxu1 %v1740_v61  ;;  %v1734_v63 = vld [vmem:[%s3070_s22 + $0x8] sm:$0xf] }
 0x5a2   : > { %2559 = vmatprep.subr.bf16.mxu1 %v2843_v9  ;;  %v1832_v12 = vsel %vm1546_vm6, %v1734_v63, 0 }
 0x5a3   : > { %v1542_v2 = vpack.c.bf16 %v1538_v0, %v1538_v0  ;;  %v2680_v0 = vld [vmem:[%s3087_s4 + $0x8] sm:$0xff]  }
 0x5a5   : > { %2544 = vmatmul.mubr.msk.bf16.vlgmr.msra.gmra.mxu0 %vm1310_vm5, %v1542_v2  ;;  %v2681_v2 = vld [vmem:[%s3087_s4] sm:$0xff]  }
 0x5a6   : > { %2555 = vmatprep.mubr.msk.bf16.mxu0 %vm2844_vm2, %v2843_v9  ;;  %2554 = vmatpush3.bf16.msra.mxu0 %v1786_v5 }
 0x5a7   : > { %2565 = vmatprep.subr.bf16.mxu0 %v2843_v9 }
 0x63a   : > { %v1584_v7 = vpop.f32.mrf.mxu1  ;;  %v1630_v8 = vpop.f32.mrf.mxu0 }
 0x63b   : > { %v1728_v10 = vpack.c.bf16 %v1584_v7, %v1584_v7  ;;  %v1729_v11 = vpack.c.bf16 %v1630_v8, %v1630_v8  ;;  %v2433_v8 = vld [vmem:[%s3491_s19] ss:$0 sm:$0xff] }
 0x63c   : > { %v2527_v14 = vpop.f32.mrf.mxu1  ;;  %v2533_v15 = vpop.f32.mrf.mxu0 }
 0x63d   : > { %2550 = vmatmul.mubr.msk.bf16.vlgmr.msra.gmra.mxu1 %vm1310_vm5, %v1728_v10  ;;  %2556 = vmatmul.mubr.msk.bf16.vlgmr.msra.gmra.mxu0 %vm1310_vm5, %v1729_v11 }
 0x63e   : > { %v1587_v16 = vpop.f32.mrf.mxu1  ;;  %v1633_v17 = vpop.f32.mrf.mxu0  ;;  %2560 = vmatpush3.bf16.msra.mxu1 %v1832_v12  ;;  %2566 = vmatpush3.bf16.msra.mxu0 %v1878_v13  ;;  %v2434_v12 = vld [vmem:[%s724_s25] ss:$0 sm:$0xff] }
 0x63f   : > { %2561 = vmatprep.mubr.msk.bf16.mxu1 %vm2844_vm2, %v2843_v9  ;;  %2567 = vmatprep.mubr.msk.bf16.mxu0 %vm2844_vm2, %v2843_v9  ;;  %v2682_v16 = vld [vmem:[%s3097_s7 + $0x18] sm:$0xff]   ;;  %v2683_v17 = vld [vmem:[%s3097_s7 + $0x10] sm:$0xff]  }
 0x640   : > { %v2528_v18 = vpop.f32.mrf.mxu1  ;;  %v2534_v19 = vpop.f32.mrf.mxu0  ;;  %2571 = vmatprep.subr.bf16.mxu1 %v2843_v9  ;;  %2579 = vmatprep.subr.bf16.mxu0 %v2843_v9 }
 0x641   : > { %v2684_v18 = vld [vmem:[%s3097_s7 + $0x8] sm:$0xff]   ;;  %v2685_v19 = vld [vmem:[%s3097_s7] sm:$0xff]  }
 0x660   : > { %v1676_v20 = vpop.f32.mrf.mxu1 }
 0x661   : > { %v1730_v21 = vpack.c.bf16 %v1676_v20, %v1676_v20  ;;  %v2435_v20 = vld [vmem:[%s732_s0] ss:$0 sm:$0xff] }
 0x662   : > { %v2539_v22 = vpop.f32.mrf.mxu1 }
 0x663   : > { %2562 = vmatmul.mubr.msk.bf16.vlgmr.msra.gmra.mxu1 %vm1310_vm5, %v1730_v21 }
 0x664   : > { %v1679_v23 = vpop.f32.mrf.mxu1  ;;  %2575 = vmatprep.mubr.msk.bf16.mxu1 %vm2844_vm2, %v2843_v9  ;;  %2572 = vmatpush3.bf16.msra.mxu1 %v2680_v0 }
 0x665   : > { %v1722_v24 = vpop.f32.mrf.mxu0  ;;  %2573 = vmatprep.subr.bf16.mxu1 %v2843_v9 }
 0x666   : > { %v1731_v25 = vpack.c.bf16 %v1722_v24, %v1722_v24  ;;  %v2540_v26 = vpop.f32.mrf.mxu1 }
 0x667   : > { %v2545_v27 = vpop.f32.mrf.mxu0 }
 0x668   : > { %2568 = vmatmul.mubr.msk.bf16.vlgmr.msra.gmra.mxu0 %vm1310_vm5, %v1731_v25  ;;  %2574 = vmatpush3.bf16.msra.mxu1 %v2681_v2 }
 0x669   : > { %v1725_v29 = vpop.f32.mrf.mxu0  ;;  %2587 = vmatprep.mubr.msk.bf16.mxu0 %vm2844_vm2, %v2843_v9  ;;  %2580 = vmatpush3.bf16.msra.mxu0 %v2682_v16 }
 0x66a   : > { %2581 = vmatprep.subr.bf16.mxu0 %v2843_v9 }
 0x66b   : > { %v2546_v30 = vpop.f32.mrf.mxu0 }
 0x66d   : > { %2582 = vmatpush3.bf16.msra.mxu0 %v2683_v17 }
 0x66e   : > { %2583 = vmatprep.subr.bf16.mxu0 %v2843_v9 }
 0x671   : > { %2584 = vmatpush3.bf16.msra.mxu0 %v2684_v18 }
 0x672   : > { %2585 = vmatprep.subr.bf16.mxu0 %v2843_v9 }
 0x675   : > { %2586 = vmatpush3.bf16.msra.mxu0 %v2685_v19 }
 0x6fd   : > { %v1776_v31 = vpop.f32.mrf.mxu1  ;;  %v1822_v35 = vpop.f32.mrf.mxu0 }
 0x6fe   : > { %v1920_v42 = vsel %vm752_vm1, %v1776_v31, 0.0  ;;  %v1921_v43 = vsel %vm752_vm1, %v1822_v35, 0.0 }
 0x6ff   : > { %v2551_v36 = vpop.f32.mrf.mxu1  ;;  %v2557_v37 = vpop.f32.mrf.mxu0  ;;  %v1922_v48 = vadd.f32 %v1921_v43, %v1920_v42 }
 0x701   : > { %v1779_v38 = vpop.f32.mrf.mxu1  ;;  %v1825_v39 = vpop.f32.mrf.mxu0 }
 0x702   : > { %v2439_v39 = vld [vmem:[%s740_s1] ss:$0 sm:$0xff]  ;;  %s3494_s1 = sld [smem:[#allocation29_spill]] (!%p2445_p11) }
 0x703   : > { %v2552_v40 = vpop.f32.mrf.mxu1  ;;  %v2558_v41 = vpop.f32.mrf.mxu0 }
 0x723   : > { %v1868_v44 = vpop.f32.mrf.mxu1 }
 0x724   : > { %v1923_v46 = vsel %vm752_vm1, %v1868_v44, 0.0 }
 0x725   : > { %v2563_v47 = vpop.f32.mrf.mxu1  ;;  %v1924_v49 = vadd.f32 %v1923_v46, %v1922_v48 }
 0x727   : > { %v1871_v45 = vpop.f32.mrf.mxu1 }
 0x728   : > { %v1914_v50 = vpop.f32.mrf.mxu0 }
 0x729   : > { %v1925_v53 = vsel %vm752_vm1, %v1914_v50, 0.0  ;;  %v2564_v28 = vpop.f32.mrf.mxu1 }
 0x72a   : > { %v1926_v56 = vadd.f32 %v1925_v53, %v1924_v49  ;;  %v2569_v57 = vpop.f32.mrf.mxu0 }
 0x72c   : > { %v1934_v55 = vadd.f32 %v2432_v54, %v1926_v56  ;;  %v1917_v58 = vpop.f32.mrf.mxu0 }
 0x72e   : > { %v2570_v51 = vpop.f32.mrf.mxu0  ;;  %v3322_v52 = vadd.f32 %v1934_v55, %v3108_v1 }
 0x730   : > { %v1938_v59 = vsel %vm752_vm1, %v3322_v52, 0.0 }
 0x731   : > { %1939 = vadd.xlane.f32.xlu0 %v1938_v59 }
 0x7ba   : > { %v1940_v60 = vpop.xlane.xlu0 %1939 }
 0x7bb   : > { %v1941_v62 = vmul.f32 0.03125, %v1940_v60 }
 0x7bd   : > { %v1942_v33 = vsub.f32 %v3322_v52, %v1941_v62 }
 0x7bf   : > { %v1943_v32 = vmul.f32 %v1942_v33, %v1942_v33  ;;  %v1961_v10 = vmul.f32 %v2433_v8, %v1942_v33 }
 0x7c1   : > { %v1944_v34 = vsel %vm752_vm1, %v1943_v32, 0.0 }
 0x7c2   : > { %1945 = vadd.xlane.f32.xlu0 %v1944_v34 }
 0x84b   : > { %v1946_v1 = vpop.xlane.xlu0 %1945 }
 0x84c   : > { %v1947_v3 = vmul.f32 0.03125, %v1946_v1 }
 0x84e   : > { %2706 = vrsqrt.f32 %v1947_v3  ;;  %vm1950_vm7 = vcmp.eq.f32.partialorder %v1947_v3, inf  ;;  %v1953_v5 = vand.u32 2147483648, %v1947_v3  ;;  %vm1952_vm8 = vcmp.eq.f32.partialorder %v1947_v3, 0.0 }
 0x85b   : > { %v2707_v4 = vpop.eup %2706 }
 0x85c   : > { %v1949_v61 = vmul.f32 %v2707_v4, %v1947_v3 }
 0x85e   : > { %v1951_v63 = vsel %vm1950_vm7, %v1947_v3, %v1949_v61 }
 0x85f   : > { %v1954_v6 = vsel %vm1952_vm8, %v1953_v5, %v1951_v63 }
 0x860   : > { %v1962_v7 = vadd.f32 1e-05, %v1954_v6 }
 0x862   : > { %2708 = vrcp.f32 %v1962_v7 }
 0x86f   : > { %v2709_v11 = vpop.eup %2708 }
 0x870   : > { %v1964_v13 = vmul.f32 %v2709_v11, %v1961_v10 }
 0x872   : > { %v1971_v14 = vadd.f32 %v2434_v12, %v1964_v13 }
 0x874   : > { %v1972_v15 = vpack.c.bf16 %v1971_v14, %v1971_v14 }
 0x876   : > { %2576 = vmatmul.mubr.msk.bf16.vlgmr.msra.gmra.mxu1 %vm752_vm1, %v1972_v15 }
 0x936   : > { %v2033_v21 = vpop.f32.mrf.mxu1 }
 0x937   : > { %v2034_v22 = vadd.f32 %v2435_v20, %v2033_v21 }
 0x938   : > { %v2577_v23 = vpop.f32.mrf.mxu1 }
 0x939   : > { %v2040_v24 = vmul.f32 %v2034_v22, %v2034_v22  ;;  %v2039_v35 = vmul.f32 0.5, %v2034_v22 }
 0x93a   : > { %v2036_v25 = vpop.f32.mrf.mxu1 }
 0x93b   : > { %v2041_v26 = vmul.f32 %v2040_v24, %v2034_v22 }
 0x93c   : > { %v2578_v27 = vpop.f32.mrf.mxu1 }
 0x93d   : > { %v2042_v29 = vmul.f32 0.044715, %v2041_v26 }
 0x93f   : > { %v2043_v30 = vadd.f32 %v2042_v29, %v2034_v22 }
 0x941   : > { %v2044_v31 = vmul.f32 0.79783285, %v2043_v30 }
 0x943   : > { %2710 = vtanh.f32 %v2044_v31 }
 0x950   : > { %v2711_v9 = vpop.eup %2710 }
 0x951   : > { %v2046_v36 = vadd.f32 1.0, %v2711_v9 }
 0x953   : > { %v2047_v37 = vmul.f32 %v2046_v36, %v2039_v35 }
 0x955   : > { %v2048_v38 = vpack.c.bf16 %v2047_v37, %v2047_v37 }
 0x957   : > { %2588 = vmatmul.mubr.msk.bf16.vlgmr.msra.gmra.mxu0 %vm2088_vm9, %v2048_v38 }
 0xa17   : > { %v2126_v40 = vpop.f32.mrf.mxu0 }
 0xa18   : > { %v2127_v41 = vadd.f32 %v2439_v39, %v2126_v40 }
 0xa19   : > { %v2589_v42 = vpop.f32.mrf.mxu0  ;;  %2137 = sbr.rel (%p2445_p11) target bundleno = 2915 (0xb63), region = 96 }
 0xa1a   : > { %v2132_v43 = vadd.f32 %v2127_v41, %v3322_v52 }
 0xa1b   : > { %v2129_v44 = vpop.f32.mrf.mxu0 }
 0xa1c   : > { %2133 = vst.msk [vmem:[%s3103_s12] sm:$0xff] %vm752_vm1, %v2132_v43 }
 0xa1d   : > { %v2590_v46 = vpop.f32.mrf.mxu0 }
 0xa1e   : > { %v2140_v47 = vsel %vm752_vm1, %v2132_v43, 0.0  ;;  %v2446_v59 = vld [vmem:[%s3494_s1] ss:$0 sm:$0xff] }
 0xa1f   : > { %2141 = vadd.xlane.f32.xlu0 %v2140_v47  ;;  %v2447_v33 = vld [vmem:[%s3495_s20] ss:$0 sm:$0xff] }
 0xaa8   : > { %v2142_v48 = vpop.xlane.xlu0 %2141 }
 0xaa9   : > { %v2143_v45 = vmul.f32 0.03125, %v2142_v48 }
 0xaab   : > { %v2144_v49 = vsub.f32 %v2132_v43, %v2143_v45 }
 0xaad   : > { %v2145_v50 = vmul.f32 %v2144_v49, %v2144_v49  ;;  %v2163_v60 = vmul.f32 %v2446_v59, %v2144_v49 }
 0xaaf   : > { %v2146_v53 = vsel %vm752_vm1, %v2145_v50, 0.0 }
 0xab0   : > { %2147 = vadd.xlane.f32.xlu0 %v2146_v53 }
 0xb39   : > { %v2148_v54 = vpop.xlane.xlu0 %2147 }
 0xb3a   : > { %v2149_v28 = vmul.f32 0.03125, %v2148_v54 }
 0xb3c   : > { %2712 = vrsqrt.f32 %v2149_v28  ;;  %vm2152_vm10 = vcmp.eq.f32.partialorder %v2149_v28, inf  ;;  %v2155_v55 = vand.u32 2147483648, %v2149_v28  ;;  %vm2154_vm11 = vcmp.eq.f32.partialorder %v2149_v28, 0.0 }
 0xb49   : > { %v2713_v56 = vpop.eup %2712 }
 0xb4a   : > { %v2151_v57 = vmul.f32 %v2713_v56, %v2149_v28 }
 0xb4c   : > { %v2153_v58 = vsel %vm2152_vm10, %v2149_v28, %v2151_v57 }
 0xb4d   : > { %v2156_v51 = vsel %vm2154_vm11, %v2155_v55, %v2153_v58 }
 0xb4e   : > { %v2164_v52 = vadd.f32 1e-05, %v2156_v51 }
 0xb50   : > { %2714 = vrcp.f32 %v2164_v52 }
 0xb5d   : > { %v2715_v62 = vpop.eup %2714 }
 0xb5e   : > { %v2166_v32 = vmul.f32 %v2715_v62, %v2163_v60 }
 0xb60   : > { %v2173_v34 = vadd.f32 %v2447_v33, %v2166_v32 }
 0xb62   : > { %2174 = vst.msk [vmem:[%s3103_s12] sm:$0xff] %vm752_vm1, %v2173_v34 }
 0xb63 PF: > { %s3496_s18 = sld [smem:[#allocation11_spill]]  ;;  %s2189_s16 = sshll.u32 %s3103_s12, 4  ;;  %s2190_s16 = int_to_ptr.vmem [resolvable:$true] %s2189_s16 }
 0xb64   : > { %s3497_s26 = sld [smem:[#allocation20_spill]]  ;;  %s2744_s14 = scalar_lea.vmem %s2190_s16, 128 }
 0xb65   : > { %s3499_s15 = sld [smem:[#allocation31_spill]]  ;;  %p2745_p1 = scmp.ne.s32.totalorder %s2190_s16, %s2744_s14 }
 0xb66   : > { %s2852_s29 = smov [#allocation5]  }
 0xb67   : > { %p2746_p2 = pnand %p2745_p1, %p3001_p10  ;;  %s2748_s25 = sshll.u32 %s2852_s29, 4  ;;  %s2749_s25 = int_to_ptr.vmem [resolvable:$false] %s2748_s25 }
 0xb68   : > { %s2750_s13 = scalar_lea.vmem %s2749_s25, 256  ;;  %p2751_p5 = scmp.lt.s32.totalorder %s2190_s16, %s2749_s25 }
 0xb69   : > { %s2449_s22 = sshll.u32 %s3496_s18, 7  ;;  %p2747_p4 = pneg %p2746_p2 }
 0xb6a   : > { %s2176_s19 = scalar_lea.sflag [#allocation4], %s3497_s26  ;;  %p2752_p6 = scmp.lt.s32.totalorder %s2750_s13, %s2744_s14 }
 0xb6b   : > { %s2187_s4 = scalar_lea.hbm %s3499_s15, %s2449_s22 }
 0xb6c   : > { %p2753_p7 = por %p2752_p6, %p2751_p5 }
 0xb6e   : > { %p2754_p8 = pnand %p2753_p7, %p2747_p4 }
 0xb70   : > { %2757 = shalt.err (!%p2754_p8)
}
 0xb71   : > { %s2758_s17 = scalar_lea.hbm %s2187_s4, 128  ;;  %s2762_s0 = scalar_lea.hbm %s3499_s15, 256 }
 0xb72   : > { %p2759_p12 = scmp.ne.s32.totalorder %s2187_s4, %s2758_s17  ;;  %p2763_p0 = scmp.lt.s32.totalorder %s2187_s4, %s3499_s15 }
 0xb73   : > { %p2764_p9 = scmp.lt.s32.totalorder %s2762_s0, %s2758_s17 }
 0xb74   : > { %p2760_p3 = pnand %p2759_p12, %p3001_p10 }
 0xb75   : > { %p2765_p11 = por %p2764_p9, %p2763_p0 }
 0xb76   : > { %p2761_p13 = pneg %p2760_p3 }
 0xb78   : > { %p2766_p1 = pnand %p2765_p11, %p2761_p13 }
 0xb7a   : > { %2769 = shalt.err (!%p2766_p1)
}
 0xb7b   : > { %2593 = dma.vmem_to_hbm [thread:$0]  (%p3001_p10), %s2190_s16, 128, %s2187_s4, %s2176_s19  }
 0xb7c PF: > { %s3500_s11 = sld [smem:[#allocation14_spill]] }
 0xb7d   : > { %s3501_s1 = sld [smem:[#allocation8_spill]] }
 0xb7e   : > { %s3502_s30 = sld [smem:[#allocation18_spill]] }
 0xb82   : > { %p2604_p2 = scmp.ge.s32.totalorder %s3500_s11, 2 }
 0xb83   : > { %s2201_s21 = sand.u32 1, %s3501_s1  }
 0xb84   : > { %p3503_p4 = scmp.ne.s32.totalorder %s3502_s30, 0  ;;  %s2202_s20 = scalar_lea.sflag [#allocation4], %s2201_s21 }
 0xb86   : > { %p2600_p5 = pnand %p2604_p2, %p3503_p4 }
 0xb88   : > { %p2601_p6 = pneg %p2600_p5 }
 0xb8a   : > { %2807 = dma.done.wait (%p2601_p6), %s2202_s20, 128  }
 0xb8b   : > { %2809 = vsyncadd (%p2601_p6), %s2202_s20, 4294967168  ;;  %s32_s28 = sadd.s32 1, %s3500_s11   ;;  %s3504_s21 = sld [smem:[#allocation9_spill]] }
 0xb8c   : > { %p29_p7 = scmp.ge.s32.totalorder %s32_s28, 6   ;;  %s3505_s22 = sld [smem:[#allocation10_spill]] }
 0xb8d   : > { %s3506_s23 = sld [smem:[#allocation19_spill]] }
 0xb8e   : > { %s3507_s24 = sld [smem:[#allocation12_spill]]  ;;  %31 = sbr.rel (!%p29_p7) target bundleno = 19 (0x13), region = 173 }
 0xb8f   : > { %s3508_s25 = sld [smem:[#allocation13_spill]] }
 0xb90   : > { %s3509_s26 = sld [smem:[#allocation15_spill]] }
 0xb91   : > { %s3510_s27 = sld [smem:[#allocation16_spill]] }
 0xb93   :  { %2207 = vsyncpa [#allocation3], 1 }
 0xb94   :  { %2209 = vsyncpa [#allocation3 + $0x1], 1 }
 0xb95   :  { %2210 = vsyncpa [#allocation4], 1 }
 0xb96   :  { %2212 = vsyncpa [#allocation4 + $0x1], 1 }

</bundles_post_ra>
